<compile_context>
chip_gen: v5e
topology: v5e:2x2
jax: 0.10.0
libtpu: 0.0.40
codegen_flags: <defaults>
</compile_context>

<pallas_src>
import jax
import jax.numpy as jnp
from jax.experimental import pallas as pl
from jax.experimental.pallas import tpu as pltpu


def _decoder_kernel(ann_ref,
                    wa1_h_ref, wa1_a_ref, ba1_ref, wa2_ref,
                    wf1_h_ref, wf1_y_ref, wf1_c_ref, bf1_ref,
                    wf2_ref, bf2_ref,
                    wg1_y_ref, wg1_c_ref, wfg_ref, bgf_ref,
                    wg2_ref, bg2_ref,
                    wgfc_ref, bgfc_ref,
                    out_ref):
    ann = ann_ref[...]                                   # (B, N, A), A = 2H
    B, N, A = ann.shape
    H = wa1_a_ref.shape[1]
    V = wgfc_ref.shape[1]
    T = out_ref.shape[1] // V

    # ---- hoisted, loop-invariant annotation projection ----
    pre_a = jnp.dot(ann.reshape(B * N, A), wa1_a_ref[...],
                    preferred_element_type=jnp.float32)          # (B*N, H)
    pre_a = pre_a.reshape(B, N, H) + ba1_ref[...][None, :, :]    # (B, N, H)
    wa2_row = wa2_ref[...]                                       # (1, H), reused

    h = None   # recurrent hidden state; step 0 is peeled (h = y = 0)
    y = None   # recurrent output state

    for t in range(T):                                   # static, fully unrolled
        # ---------------- attention ----------------
        if t == 0:
            hid = jnp.maximum(pre_a, 0.0)                # pre_h == 0
        else:
            pre_h = jnp.dot(h, wa1_h_ref[...],
                            preferred_element_type=jnp.float32)  # (B, H)
            hid = jnp.maximum(pre_a + pre_h[:, None, :], 0.0)
        # 2nd Wa layer (H -> 1) as a lane reduce; ba2 cancels under softmax.
        energy = jnp.sum(hid * wa2_row, axis=-1)                 # (B, N)

        m = jnp.max(energy, axis=-1, keepdims=True)
        e = jnp.exp(energy - m)
        inv = pl.reciprocal(jnp.sum(e, axis=-1, keepdims=True), approx=True)
        w = e * inv                                              # (B, N)

        # context: sum_n w[b,n] * ann[b,n,:] on the VPU/XLU
        c = jnp.sum(ann * w[:, :, None], axis=1)                 # (B, A)

        # ---------------- f first layer (split dots, no concat) ----------------
        pf = jnp.dot(c, wf1_c_ref[...],
                     preferred_element_type=jnp.float32) + bf1_ref[...]
        if t > 0:
            pf = pf + jnp.dot(h, wf1_h_ref[...],
                              preferred_element_type=jnp.float32)
            pf = pf + jnp.dot(y, wf1_y_ref[...],
                              preferred_element_type=jnp.float32)
        hf = jnp.maximum(pf, 0.0)                                # (B, H//2)

        # ---------------- g first layer (f->g fold: no wait on h_new) ----------
        pg = jnp.dot(c, wg1_c_ref[...],
                     preferred_element_type=jnp.float32) + bgf_ref[...]
        pg = pg + jnp.dot(hf, wfg_ref[...],
                          preferred_element_type=jnp.float32)
        if t > 0:
            pg = pg + jnp.dot(y, wg1_y_ref[...],
                              preferred_element_type=jnp.float32)
        hg = jnp.maximum(pg, 0.0)                                # (B, E//2)

        # ---------------- logits (fc folded into g's 2nd layer) ----------------
        logits = jnp.dot(hg, wgfc_ref[...],
                         preferred_element_type=jnp.float32) + bgfc_ref[...]
        out_ref[:, t * V:(t + 1) * V] = logits.astype(out_ref.dtype)

        # ---------------- state for next step (off the critical path) ----------
        if t + 1 < T:
            h = jnp.dot(hf, wf2_ref[...],
                        preferred_element_type=jnp.float32) + bf2_ref[...]   # (B, H)
            y = jnp.dot(hg, wg2_ref[...],
                        preferred_element_type=jnp.float32) + bg2_ref[...]   # (B, E)


def attention_decoder_41_forward(hidden_state, decode_length, annotations, params):
    """hidden_state: (B, H) (unused, zeroed like the module); annotations: (B, N, 2H).
    Returns (B, T, V)."""
    del hidden_state  # zeroed inside the module's forward
    B, N, A = annotations.shape
    H = params["wa2"].shape[1]
    E = params["wg2"].shape[1]
    V = params["wfc"].shape[1]
    T = int(decode_length)

    # ---- split weights by input-row group (removes in-kernel slices/concats) ----
    wa1 = params["wa1"]
    wa1_h, wa1_a = wa1[:H, :], wa1[H:, :]
    ba1, wa2 = params["ba1"], params["wa2"]

    wf1 = params["wf1"]
    wf1_h, wf1_y, wf1_c = wf1[:H, :], wf1[H:H + E, :], wf1[H + E:, :]
    bf1, wf2, bf2 = params["bf1"], params["wf2"], params["bf2"]

    wg1 = params["wg1"]
    wg1_y, wg1_h, wg1_c = wg1[:E, :], wg1[E:E + H, :], wg1[E + H:, :]
    bg1, wg2, bg2 = params["bg1"], params["wg2"], params["bg2"]
    wfc, bfc = params["wfc"], params["bfc"]

    # ---- algebraic folds (one-time, outside the kernel) ----
    # f -> g:  h_new @ wg1_h = hf @ (wf2 @ wg1_h) + bf2 @ wg1_h
    wfg = wf2 @ wg1_h                       # (H//2, E//2)
    bgf = bf2 @ wg1_h + bg1                 # (1, E//2)
    # g -> fc: y @ wfc + bfc = hg @ (wg2 @ wfc) + (bg2 @ wfc + bfc)
    wgfc = wg2 @ wfc                        # (E//2, V)
    bgfc = bg2 @ wfc + bfc                  # (1, V)

    weights = [wa1_h, wa1_a, ba1, wa2,
               wf1_h, wf1_y, wf1_c, bf1, wf2, bf2,
               wg1_y, wg1_c, wfg, bgf, wg2, bg2,
               wgfc, bgfc]

    in_specs = [pl.BlockSpec((B, N, A), lambda i: (0, 0, 0))]
    in_specs += [pl.BlockSpec(w.shape, lambda i: (0, 0)) for w in weights]

    out = pl.pallas_call(
        _decoder_kernel,
        out_shape=jax.ShapeDtypeStruct((B, T * V), jnp.float32),
        grid=(1,),
        in_specs=in_specs,
        out_specs=pl.BlockSpec((B, T * V), lambda i: (0, 0)),
        compiler_params=pltpu.CompilerParams(
            dimension_semantics=("arbitrary",)),
    )(annotations, *weights)

    return out.reshape(B, T, V)


# ----------------------- pure-JAX reference -----------------------
def reference_forward(hidden_state, decode_length, annotations, p):
    B, H = hidden_state.shape
    E = p["wg2"].shape[1]
    N = annotations.shape[1]
    h = jnp.zeros((B, H), jnp.float32)
    y = jnp.zeros((B, E), jnp.float32)
    outs = []
    for _ in range(decode_length):
        s_exp = jnp.broadcast_to(h[:, None, :], (B, N, H))
        temp = jnp.concatenate([s_exp, annotations], axis=-1)
        hid = jax.nn.relu(temp @ p["wa1"] + p["ba1"])
        energy = jnp.sum(hid * p["wa2"][None, :, :], axis=-1) + p["ba2"][0, 0]
        w = jax.nn.softmax(energy, axis=1)
        c = jnp.sum(annotations * w[:, :, None], axis=1)
        hf = jax.nn.relu(jnp.concatenate([h, y, c], axis=-1) @ p["wf1"] + p["bf1"])
        h = hf @ p["wf2"] + p["bf2"]
        hg = jax.nn.relu(jnp.concatenate([y, h, c], axis=-1) @ p["wg1"] + p["bg1"])
        y = hg @ p["wg2"] + p["bg2"]
        outs.append(y)
    outs = jnp.stack(outs, axis=1)
    return outs @ p["wfc"] + p["bfc"]


def init_params(key, E, H, V):
    A = 2 * H
    shapes = {
        "wa1": (H + A, H),          "ba1": (1, H),
        "wa2": (1, H),              "ba2": (1, 1),   # Wa 2nd layer (H -> 1), stored transposed
        "wf1": (H + E + A, H // 2), "bf1": (1, H // 2),
        "wf2": (H // 2, H),         "bf2": (1, H),
        "wg1": (E + H + A, E // 2), "bg1": (1, E // 2),
        "wg2": (E // 2, E),         "bg2": (1, E),
        "wfc": (E, V),              "bfc": (1, V),
    }
    keys = jax.random.split(key, len(shapes))
    params = {}
    for (name, shape), k in zip(shapes.items(), keys):
        params[name] = 0.1 * jax.random.normal(k, shape, dtype=jnp.float32)
    return params


if __name__ == "__main__":
    # config consistent with the module: embedding_size=32, hidden_size=32,
    # vocab_size=64, annotation_size = 2*hidden_size = 64, 8 annotations, T=6
    B, E, H, V, N, T = 2, 32, 32, 64, 8, 6

    root = jax.random.PRNGKey(0)
    k_params, k_hidden, k_ann = jax.random.split(root, 3)
    params = init_params(k_params, E, H, V)

    hidden_state = jax.random.normal(k_hidden, (B, H), dtype=jnp.float32)
    annotations = jax.random.normal(k_ann, (B, N, 2 * H), dtype=jnp.float32)

    out = attention_decoder_41_forward(hidden_state, T, annotations, params)
    out = jax.block_until_ready(out)

    ref = reference_forward(hidden_state, T, annotations, params)
    assert out.shape == (B, T, V), out.shape
    assert jnp.allclose(out, ref, atol=1e-3, rtol=1e-3), float(jnp.max(jnp.abs(out - ref)))

    print("KERNEL_OK")
</pallas_src>

<mosaic_0001>
module attributes {stable_mosaic.version = 11 : i64} {
  func.func @_decoder_kernel(%arg0: i32, %arg1: memref<2x8x64xf32, #tpu.memory_space<vmem>>, %arg2: memref<32x32xf32, #tpu.memory_space<vmem>>, %arg3: memref<64x32xf32, #tpu.memory_space<vmem>>, %arg4: memref<1x32xf32, #tpu.memory_space<vmem>>, %arg5: memref<1x32xf32, #tpu.memory_space<vmem>>, %arg6: memref<32x16xf32, #tpu.memory_space<vmem>>, %arg7: memref<32x16xf32, #tpu.memory_space<vmem>>, %arg8: memref<64x16xf32, #tpu.memory_space<vmem>>, %arg9: memref<1x16xf32, #tpu.memory_space<vmem>>, %arg10: memref<16x32xf32, #tpu.memory_space<vmem>>, %arg11: memref<1x32xf32, #tpu.memory_space<vmem>>, %arg12: memref<32x16xf32, #tpu.memory_space<vmem>>, %arg13: memref<64x16xf32, #tpu.memory_space<vmem>>, %arg14: memref<16x16xf32, #tpu.memory_space<vmem>>, %arg15: memref<1x16xf32, #tpu.memory_space<vmem>>, %arg16: memref<16x32xf32, #tpu.memory_space<vmem>>, %arg17: memref<1x32xf32, #tpu.memory_space<vmem>>, %arg18: memref<16x64xf32, #tpu.memory_space<vmem>>, %arg19: memref<1x64xf32, #tpu.memory_space<vmem>>, %arg20: memref<2x384xf32, #tpu.memory_space<vmem>>) attributes {dimension_semantics = [#tpu.dimension_semantics<arbitrary>], iteration_bounds = array<i64: 1>, scalar_prefetch = 0 : i64, scratch_operands = 0 : i64, tpu.core_type = #tpu.core_type<tc>, window_params = [{pipeline_mode = #tpu.pipeline_mode<synchronous>, transform_indices = @transform_0, window_bounds = array<i64: 2, 8, 64>}, {pipeline_mode = #tpu.pipeline_mode<synchronous>, transform_indices = @transform_1, window_bounds = array<i64: 32, 32>}, {pipeline_mode = #tpu.pipeline_mode<synchronous>, transform_indices = @transform_2, window_bounds = array<i64: 64, 32>}, {pipeline_mode = #tpu.pipeline_mode<synchronous>, transform_indices = @transform_3, window_bounds = array<i64: 1, 32>}, {pipeline_mode = #tpu.pipeline_mode<synchronous>, transform_indices = @transform_4, window_bounds = array<i64: 1, 32>}, {pipeline_mode = #tpu.pipeline_mode<synchronous>, transform_indices = @transform_5, window_bounds = array<i64: 32, 16>}, {pipeline_mode = #tpu.pipeline_mode<synchronous>, transform_indices = @transform_6, window_bounds = array<i64: 32, 16>}, {pipeline_mode = #tpu.pipeline_mode<synchronous>, transform_indices = @transform_7, window_bounds = array<i64: 64, 16>}, {pipeline_mode = #tpu.pipeline_mode<synchronous>, transform_indices = @transform_8, window_bounds = array<i64: 1, 16>}, {pipeline_mode = #tpu.pipeline_mode<synchronous>, transform_indices = @transform_9, window_bounds = array<i64: 16, 32>}, {pipeline_mode = #tpu.pipeline_mode<synchronous>, transform_indices = @transform_10, window_bounds = array<i64: 1, 32>}, {pipeline_mode = #tpu.pipeline_mode<synchronous>, transform_indices = @transform_11, window_bounds = array<i64: 32, 16>}, {pipeline_mode = #tpu.pipeline_mode<synchronous>, transform_indices = @transform_12, window_bounds = array<i64: 64, 16>}, {pipeline_mode = #tpu.pipeline_mode<synchronous>, transform_indices = @transform_13, window_bounds = array<i64: 16, 16>}, {pipeline_mode = #tpu.pipeline_mode<synchronous>, transform_indices = @transform_14, window_bounds = array<i64: 1, 16>}, {pipeline_mode = #tpu.pipeline_mode<synchronous>, transform_indices = @transform_15, window_bounds = array<i64: 16, 32>}, {pipeline_mode = #tpu.pipeline_mode<synchronous>, transform_indices = @transform_16, window_bounds = array<i64: 1, 32>}, {pipeline_mode = #tpu.pipeline_mode<synchronous>, transform_indices = @transform_17, window_bounds = array<i64: 16, 64>}, {pipeline_mode = #tpu.pipeline_mode<synchronous>, transform_indices = @transform_18, window_bounds = array<i64: 1, 64>}, {pipeline_mode = #tpu.pipeline_mode<synchronous>, transform_indices = @transform_19, window_bounds = array<i64: 2, 384>}]} {
    %c0 = arith.constant 0 : index
    %c0_0 = arith.constant 0 : index
    %c0_1 = arith.constant 0 : index
    %0 = vector.load %arg1[%c0, %c0_0, %c0_1] : memref<2x8x64xf32, #tpu.memory_space<vmem>>, vector<2x8x64xf32>
    %1 = vector.shape_cast %0 : vector<2x8x64xf32> to vector<16x64xf32>
    %c0_2 = arith.constant 0 : index
    %c0_3 = arith.constant 0 : index
    %2 = vector.load %arg3[%c0_2, %c0_3] : memref<64x32xf32, #tpu.memory_space<vmem>>, vector<64x32xf32>
    %cst = arith.constant dense<0.000000e+00> : vector<16x32xf32>
    %3 = tpu.matmul %1, %2, %cst {dimension_numbers = #tpu.dot_dimension_numbers<[1], [0], [0], [1], [0, 0, 1, 1], [], []>} : vector<16x64xf32>, vector<64x32xf32>, vector<16x32xf32> -> vector<16x32xf32>
    %4 = vector.shape_cast %3 : vector<16x32xf32> to vector<2x8x32xf32>
    %c0_4 = arith.constant 0 : index
    %c0_5 = arith.constant 0 : index
    %5 = vector.load %arg4[%c0_4, %c0_5] : memref<1x32xf32, #tpu.memory_space<vmem>>, vector<1x32xf32>
    %6 = vector.shape_cast %5 : vector<1x32xf32> to vector<1x1x32xf32>
    %7 = vector.broadcast %6 : vector<1x1x32xf32> to vector<2x8x32xf32>
    %8 = arith.addf %4, %7 : vector<2x8x32xf32>
    %c0_6 = arith.constant 0 : index
    %c0_7 = arith.constant 0 : index
    %9 = vector.load %arg5[%c0_6, %c0_7] : memref<1x32xf32, #tpu.memory_space<vmem>>, vector<1x32xf32>
    %cst_8 = arith.constant 0.000000e+00 : f32
    %10 = vector.broadcast %cst_8 : f32 to vector<2x8x32xf32>
    %11 = arith.maximumf %8, %10 : vector<2x8x32xf32>
    %12 = vector.shape_cast %9 : vector<1x32xf32> to vector<1x1x32xf32>
    %13 = vector.broadcast %12 : vector<1x1x32xf32> to vector<2x8x32xf32>
    %14 = arith.mulf %11, %13 : vector<2x8x32xf32>
    %cst_9 = arith.constant dense<0.000000e+00> : vector<2x8xf32>
    %15 = vector.multi_reduction <add>, %14, %cst_9 [2] : vector<2x8x32xf32> to vector<2x8xf32>
    %cst_10 = arith.constant dense<0xFF800000> : vector<2xf32>
    %16 = vector.multi_reduction <maximumf>, %15, %cst_10 [1] : vector<2x8xf32> to vector<2xf32>
    %17 = vector.shape_cast %16 : vector<2xf32> to vector<2x1xf32>
    %18 = vector.broadcast %17 : vector<2x1xf32> to vector<2x8xf32>
    %19 = arith.subf %15, %18 : vector<2x8xf32>
    %20 = math.exp %19 : vector<2x8xf32>
    %cst_11 = arith.constant dense<0.000000e+00> : vector<2xf32>
    %21 = vector.multi_reduction <add>, %20, %cst_11 [1] : vector<2x8xf32> to vector<2xf32>
    %22 = vector.shape_cast %21 : vector<2xf32> to vector<2x1xf32>
    %23 = tpu.reciprocal %22 {approx = true} : vector<2x1xf32> -> vector<2x1xf32>
    %24 = vector.broadcast %23 : vector<2x1xf32> to vector<2x8xf32>
    %25 = arith.mulf %20, %24 : vector<2x8xf32>
    %26 = vector.shape_cast %25 : vector<2x8xf32> to vector<2x8x1xf32>
    %27 = vector.broadcast %26 : vector<2x8x1xf32> to vector<2x8x64xf32>
    %28 = arith.mulf %0, %27 : vector<2x8x64xf32>
    %cst_12 = arith.constant dense<0.000000e+00> : vector<2x64xf32>
    %29 = vector.multi_reduction <add>, %28, %cst_12 [1] : vector<2x8x64xf32> to vector<2x64xf32>
    %c0_13 = arith.constant 0 : index
    %c0_14 = arith.constant 0 : index
    %30 = vector.load %arg8[%c0_13, %c0_14] : memref<64x16xf32, #tpu.memory_space<vmem>>, vector<64x16xf32>
    %cst_15 = arith.constant dense<0.000000e+00> : vector<2x16xf32>
    %31 = tpu.matmul %29, %30, %cst_15 {dimension_numbers = #tpu.dot_dimension_numbers<[1], [0], [0], [1], [0, 0, 1, 1], [], []>} : vector<2x64xf32>, vector<64x16xf32>, vector<2x16xf32> -> vector<2x16xf32>
    %c0_16 = arith.constant 0 : index
    %c0_17 = arith.constant 0 : index
    %32 = vector.load %arg9[%c0_16, %c0_17] : memref<1x16xf32, #tpu.memory_space<vmem>>, vector<1x16xf32>
    %33 = vector.broadcast %32 : vector<1x16xf32> to vector<2x16xf32>
    %34 = arith.addf %31, %33 : vector<2x16xf32>
    %cst_18 = arith.constant 0.000000e+00 : f32
    %35 = vector.broadcast %cst_18 : f32 to vector<2x16xf32>
    %36 = arith.maximumf %34, %35 : vector<2x16xf32>
    %c0_19 = arith.constant 0 : index
    %c0_20 = arith.constant 0 : index
    %37 = vector.load %arg13[%c0_19, %c0_20] : memref<64x16xf32, #tpu.memory_space<vmem>>, vector<64x16xf32>
    %cst_21 = arith.constant dense<0.000000e+00> : vector<2x16xf32>
    %38 = tpu.matmul %29, %37, %cst_21 {dimension_numbers = #tpu.dot_dimension_numbers<[1], [0], [0], [1], [0, 0, 1, 1], [], []>} : vector<2x64xf32>, vector<64x16xf32>, vector<2x16xf32> -> vector<2x16xf32>
    %c0_22 = arith.constant 0 : index
    %c0_23 = arith.constant 0 : index
    %39 = vector.load %arg15[%c0_22, %c0_23] : memref<1x16xf32, #tpu.memory_space<vmem>>, vector<1x16xf32>
    %40 = vector.broadcast %39 : vector<1x16xf32> to vector<2x16xf32>
    %41 = arith.addf %38, %40 : vector<2x16xf32>
    %c0_24 = arith.constant 0 : index
    %c0_25 = arith.constant 0 : index
    %42 = vector.load %arg14[%c0_24, %c0_25] : memref<16x16xf32, #tpu.memory_space<vmem>>, vector<16x16xf32>
    %cst_26 = arith.constant dense<0.000000e+00> : vector<2x16xf32>
    %43 = tpu.matmul %36, %42, %cst_26 {dimension_numbers = #tpu.dot_dimension_numbers<[1], [0], [0], [1], [0, 0, 1, 1], [], []>} : vector<2x16xf32>, vector<16x16xf32>, vector<2x16xf32> -> vector<2x16xf32>
    %44 = arith.addf %41, %43 : vector<2x16xf32>
    %cst_27 = arith.constant 0.000000e+00 : f32
    %45 = vector.broadcast %cst_27 : f32 to vector<2x16xf32>
    %46 = arith.maximumf %44, %45 : vector<2x16xf32>
    %c0_28 = arith.constant 0 : index
    %c0_29 = arith.constant 0 : index
    %47 = vector.load %arg18[%c0_28, %c0_29] : memref<16x64xf32, #tpu.memory_space<vmem>>, vector<16x64xf32>
    %cst_30 = arith.constant dense<0.000000e+00> : vector<2x64xf32>
    %48 = tpu.matmul %46, %47, %cst_30 {dimension_numbers = #tpu.dot_dimension_numbers<[1], [0], [0], [1], [0, 0, 1, 1], [], []>} : vector<2x16xf32>, vector<16x64xf32>, vector<2x64xf32> -> vector<2x64xf32>
    %c0_31 = arith.constant 0 : index
    %c0_32 = arith.constant 0 : index
    %49 = vector.load %arg19[%c0_31, %c0_32] : memref<1x64xf32, #tpu.memory_space<vmem>>, vector<1x64xf32>
    %50 = vector.broadcast %49 : vector<1x64xf32> to vector<2x64xf32>
    %51 = arith.addf %48, %50 : vector<2x64xf32>
    %c0_33 = arith.constant 0 : index
    %c0_34 = arith.constant 0 : index
    %52 = vector.load %arg20[%c0_33, %c0_34] : memref<2x384xf32, #tpu.memory_space<vmem>>, vector<2x64xf32>
    tpu.vector_store %arg20[%c0_33, %c0_34], %51 {strides = array<i32>} : memref<2x384xf32, #tpu.memory_space<vmem>>, vector<2x64xf32>,
    %c0_35 = arith.constant 0 : index
    %c0_36 = arith.constant 0 : index
    %53 = vector.load %arg10[%c0_35, %c0_36] : memref<16x32xf32, #tpu.memory_space<vmem>>, vector<16x32xf32>
    %cst_37 = arith.constant dense<0.000000e+00> : vector<2x32xf32>
    %54 = tpu.matmul %36, %53, %cst_37 {dimension_numbers = #tpu.dot_dimension_numbers<[1], [0], [0], [1], [0, 0, 1, 1], [], []>} : vector<2x16xf32>, vector<16x32xf32>, vector<2x32xf32> -> vector<2x32xf32>
    %c0_38 = arith.constant 0 : index
    %c0_39 = arith.constant 0 : index
    %55 = vector.load %arg11[%c0_38, %c0_39] : memref<1x32xf32, #tpu.memory_space<vmem>>, vector<1x32xf32>
    %56 = vector.broadcast %55 : vector<1x32xf32> to vector<2x32xf32>
    %57 = arith.addf %54, %56 : vector<2x32xf32>
    %c0_40 = arith.constant 0 : index
    %c0_41 = arith.constant 0 : index
    %58 = vector.load %arg16[%c0_40, %c0_41] : memref<16x32xf32, #tpu.memory_space<vmem>>, vector<16x32xf32>
    %cst_42 = arith.constant dense<0.000000e+00> : vector<2x32xf32>
    %59 = tpu.matmul %46, %58, %cst_42 {dimension_numbers = #tpu.dot_dimension_numbers<[1], [0], [0], [1], [0, 0, 1, 1], [], []>} : vector<2x16xf32>, vector<16x32xf32>, vector<2x32xf32> -> vector<2x32xf32>
    %c0_43 = arith.constant 0 : index
    %c0_44 = arith.constant 0 : index
    %60 = vector.load %arg17[%c0_43, %c0_44] : memref<1x32xf32, #tpu.memory_space<vmem>>, vector<1x32xf32>
    %61 = vector.broadcast %60 : vector<1x32xf32> to vector<2x32xf32>
    %62 = arith.addf %59, %61 : vector<2x32xf32>
    %c0_45 = arith.constant 0 : index
    %c0_46 = arith.constant 0 : index
    %63 = vector.load %arg2[%c0_45, %c0_46] : memref<32x32xf32, #tpu.memory_space<vmem>>, vector<32x32xf32>
    %cst_47 = arith.constant dense<0.000000e+00> : vector<2x32xf32>
    %64 = tpu.matmul %57, %63, %cst_47 {dimension_numbers = #tpu.dot_dimension_numbers<[1], [0], [0], [1], [0, 0, 1, 1], [], []>} : vector<2x32xf32>, vector<32x32xf32>, vector<2x32xf32> -> vector<2x32xf32>
    %65 = vector.shape_cast %64 : vector<2x32xf32> to vector<2x1x32xf32>
    %66 = vector.broadcast %65 : vector<2x1x32xf32> to vector<2x8x32xf32>
    %67 = arith.addf %8, %66 : vector<2x8x32xf32>
    %cst_48 = arith.constant 0.000000e+00 : f32
    %68 = vector.broadcast %cst_48 : f32 to vector<2x8x32xf32>
    %69 = arith.maximumf %67, %68 : vector<2x8x32xf32>
    %70 = vector.shape_cast %9 : vector<1x32xf32> to vector<1x1x32xf32>
    %71 = vector.broadcast %70 : vector<1x1x32xf32> to vector<2x8x32xf32>
    %72 = arith.mulf %69, %71 : vector<2x8x32xf32>
    %cst_49 = arith.constant dense<0.000000e+00> : vector<2x8xf32>
    %73 = vector.multi_reduction <add>, %72, %cst_49 [2] : vector<2x8x32xf32> to vector<2x8xf32>
    %cst_50 = arith.constant dense<0xFF800000> : vector<2xf32>
    %74 = vector.multi_reduction <maximumf>, %73, %cst_50 [1] : vector<2x8xf32> to vector<2xf32>
    %75 = vector.shape_cast %74 : vector<2xf32> to vector<2x1xf32>
    %76 = vector.broadcast %75 : vector<2x1xf32> to vector<2x8xf32>
    %77 = arith.subf %73, %76 : vector<2x8xf32>
    %78 = math.exp %77 : vector<2x8xf32>
    %cst_51 = arith.constant dense<0.000000e+00> : vector<2xf32>
    %79 = vector.multi_reduction <add>, %78, %cst_51 [1] : vector<2x8xf32> to vector<2xf32>
    %80 = vector.shape_cast %79 : vector<2xf32> to vector<2x1xf32>
    %81 = tpu.reciprocal %80 {approx = true} : vector<2x1xf32> -> vector<2x1xf32>
    %82 = vector.broadcast %81 : vector<2x1xf32> to vector<2x8xf32>
    %83 = arith.mulf %78, %82 : vector<2x8xf32>
    %84 = vector.shape_cast %83 : vector<2x8xf32> to vector<2x8x1xf32>
    %85 = vector.broadcast %84 : vector<2x8x1xf32> to vector<2x8x64xf32>
    %86 = arith.mulf %0, %85 : vector<2x8x64xf32>
    %cst_52 = arith.constant dense<0.000000e+00> : vector<2x64xf32>
    %87 = vector.multi_reduction <add>, %86, %cst_52 [1] : vector<2x8x64xf32> to vector<2x64xf32>
    %c0_53 = arith.constant 0 : index
    %c0_54 = arith.constant 0 : index
    %88 = vector.load %arg8[%c0_53, %c0_54] : memref<64x16xf32, #tpu.memory_space<vmem>>, vector<64x16xf32>
    %cst_55 = arith.constant dense<0.000000e+00> : vector<2x16xf32>
    %89 = tpu.matmul %87, %88, %cst_55 {dimension_numbers = #tpu.dot_dimension_numbers<[1], [0], [0], [1], [0, 0, 1, 1], [], []>} : vector<2x64xf32>, vector<64x16xf32>, vector<2x16xf32> -> vector<2x16xf32>
    %c0_56 = arith.constant 0 : index
    %c0_57 = arith.constant 0 : index
    %90 = vector.load %arg9[%c0_56, %c0_57] : memref<1x16xf32, #tpu.memory_space<vmem>>, vector<1x16xf32>
    %91 = vector.broadcast %90 : vector<1x16xf32> to vector<2x16xf32>
    %92 = arith.addf %89, %91 : vector<2x16xf32>
    %c0_58 = arith.constant 0 : index
    %c0_59 = arith.constant 0 : index
    %93 = vector.load %arg6[%c0_58, %c0_59] : memref<32x16xf32, #tpu.memory_space<vmem>>, vector<32x16xf32>
    %cst_60 = arith.constant dense<0.000000e+00> : vector<2x16xf32>
    %94 = tpu.matmul %57, %93, %cst_60 {dimension_numbers = #tpu.dot_dimension_numbers<[1], [0], [0], [1], [0, 0, 1, 1], [], []>} : vector<2x32xf32>, vector<32x16xf32>, vector<2x16xf32> -> vector<2x16xf32>
    %95 = arith.addf %92, %94 : vector<2x16xf32>
    %c0_61 = arith.constant 0 : index
    %c0_62 = arith.constant 0 : index
    %96 = vector.load %arg7[%c0_61, %c0_62] : memref<32x16xf32, #tpu.memory_space<vmem>>, vector<32x16xf32>
    %cst_63 = arith.constant dense<0.000000e+00> : vector<2x16xf32>
    %97 = tpu.matmul %62, %96, %cst_63 {dimension_numbers = #tpu.dot_dimension_numbers<[1], [0], [0], [1], [0, 0, 1, 1], [], []>} : vector<2x32xf32>, vector<32x16xf32>, vector<2x16xf32> -> vector<2x16xf32>
    %98 = arith.addf %95, %97 : vector<2x16xf32>
    %cst_64 = arith.constant 0.000000e+00 : f32
    %99 = vector.broadcast %cst_64 : f32 to vector<2x16xf32>
    %100 = arith.maximumf %98, %99 : vector<2x16xf32>
    %c0_65 = arith.constant 0 : index
    %c0_66 = arith.constant 0 : index
    %101 = vector.load %arg13[%c0_65, %c0_66] : memref<64x16xf32, #tpu.memory_space<vmem>>, vector<64x16xf32>
    %cst_67 = arith.constant dense<0.000000e+00> : vector<2x16xf32>
    %102 = tpu.matmul %87, %101, %cst_67 {dimension_numbers = #tpu.dot_dimension_numbers<[1], [0], [0], [1], [0, 0, 1, 1], [], []>} : vector<2x64xf32>, vector<64x16xf32>, vector<2x16xf32> -> vector<2x16xf32>
    %c0_68 = arith.constant 0 : index
    %c0_69 = arith.constant 0 : index
    %103 = vector.load %arg15[%c0_68, %c0_69] : memref<1x16xf32, #tpu.memory_space<vmem>>, vector<1x16xf32>
    %104 = vector.broadcast %103 : vector<1x16xf32> to vector<2x16xf32>
    %105 = arith.addf %102, %104 : vector<2x16xf32>
    %c0_70 = arith.constant 0 : index
    %c0_71 = arith.constant 0 : index
    %106 = vector.load %arg14[%c0_70, %c0_71] : memref<16x16xf32, #tpu.memory_space<vmem>>, vector<16x16xf32>
    %cst_72 = arith.constant dense<0.000000e+00> : vector<2x16xf32>
    %107 = tpu.matmul %100, %106, %cst_72 {dimension_numbers = #tpu.dot_dimension_numbers<[1], [0], [0], [1], [0, 0, 1, 1], [], []>} : vector<2x16xf32>, vector<16x16xf32>, vector<2x16xf32> -> vector<2x16xf32>
    %108 = arith.addf %105, %107 : vector<2x16xf32>
    %c0_73 = arith.constant 0 : index
    %c0_74 = arith.constant 0 : index
    %109 = vector.load %arg12[%c0_73, %c0_74] : memref<32x16xf32, #tpu.memory_space<vmem>>, vector<32x16xf32>
    %cst_75 = arith.constant dense<0.000000e+00> : vector<2x16xf32>
    %110 = tpu.matmul %62, %109, %cst_75 {dimension_numbers = #tpu.dot_dimension_numbers<[1], [0], [0], [1], [0, 0, 1, 1], [], []>} : vector<2x32xf32>, vector<32x16xf32>, vector<2x16xf32> -> vector<2x16xf32>
    %111 = arith.addf %108, %110 : vector<2x16xf32>
    %cst_76 = arith.constant 0.000000e+00 : f32
    %112 = vector.broadcast %cst_76 : f32 to vector<2x16xf32>
    %113 = arith.maximumf %111, %112 : vector<2x16xf32>
    %c0_77 = arith.constant 0 : index
    %c0_78 = arith.constant 0 : index
    %114 = vector.load %arg18[%c0_77, %c0_78] : memref<16x64xf32, #tpu.memory_space<vmem>>, vector<16x64xf32>
    %cst_79 = arith.constant dense<0.000000e+00> : vector<2x64xf32>
    %115 = tpu.matmul %113, %114, %cst_79 {dimension_numbers = #tpu.dot_dimension_numbers<[1], [0], [0], [1], [0, 0, 1, 1], [], []>} : vector<2x16xf32>, vector<16x64xf32>, vector<2x64xf32> -> vector<2x64xf32>
    %c0_80 = arith.constant 0 : index
    %c0_81 = arith.constant 0 : index
    %116 = vector.load %arg19[%c0_80, %c0_81] : memref<1x64xf32, #tpu.memory_space<vmem>>, vector<1x64xf32>
    %117 = vector.broadcast %116 : vector<1x64xf32> to vector<2x64xf32>
    %118 = arith.addf %115, %117 : vector<2x64xf32>
    %c0_82 = arith.constant 0 : index
    %c64 = arith.constant 64 : index
    %119 = vector.load %arg20[%c0_82, %c64] : memref<2x384xf32, #tpu.memory_space<vmem>>, vector<2x64xf32>
    tpu.vector_store %arg20[%c0_82, %c64], %118 {strides = array<i32>} : memref<2x384xf32, #tpu.memory_space<vmem>>, vector<2x64xf32>,
    %c0_83 = arith.constant 0 : index
    %c0_84 = arith.constant 0 : index
    %120 = vector.load %arg10[%c0_83, %c0_84] : memref<16x32xf32, #tpu.memory_space<vmem>>, vector<16x32xf32>
    %cst_85 = arith.constant dense<0.000000e+00> : vector<2x32xf32>
    %121 = tpu.matmul %100, %120, %cst_85 {dimension_numbers = #tpu.dot_dimension_numbers<[1], [0], [0], [1], [0, 0, 1, 1], [], []>} : vector<2x16xf32>, vector<16x32xf32>, vector<2x32xf32> -> vector<2x32xf32>
    %c0_86 = arith.constant 0 : index
    %c0_87 = arith.constant 0 : index
    %122 = vector.load %arg11[%c0_86, %c0_87] : memref<1x32xf32, #tpu.memory_space<vmem>>, vector<1x32xf32>
    %123 = vector.broadcast %122 : vector<1x32xf32> to vector<2x32xf32>
    %124 = arith.addf %121, %123 : vector<2x32xf32>
    %c0_88 = arith.constant 0 : index
    %c0_89 = arith.constant 0 : index
    %125 = vector.load %arg16[%c0_88, %c0_89] : memref<16x32xf32, #tpu.memory_space<vmem>>, vector<16x32xf32>
    %cst_90 = arith.constant dense<0.000000e+00> : vector<2x32xf32>
    %126 = tpu.matmul %113, %125, %cst_90 {dimension_numbers = #tpu.dot_dimension_numbers<[1], [0], [0], [1], [0, 0, 1, 1], [], []>} : vector<2x16xf32>, vector<16x32xf32>, vector<2x32xf32> -> vector<2x32xf32>
    %c0_91 = arith.constant 0 : index
    %c0_92 = arith.constant 0 : index
    %127 = vector.load %arg17[%c0_91, %c0_92] : memref<1x32xf32, #tpu.memory_space<vmem>>, vector<1x32xf32>
    %128 = vector.broadcast %127 : vector<1x32xf32> to vector<2x32xf32>
    %129 = arith.addf %126, %128 : vector<2x32xf32>
    %c0_93 = arith.constant 0 : index
    %c0_94 = arith.constant 0 : index
    %130 = vector.load %arg2[%c0_93, %c0_94] : memref<32x32xf32, #tpu.memory_space<vmem>>, vector<32x32xf32>
    %cst_95 = arith.constant dense<0.000000e+00> : vector<2x32xf32>
    %131 = tpu.matmul %124, %130, %cst_95 {dimension_numbers = #tpu.dot_dimension_numbers<[1], [0], [0], [1], [0, 0, 1, 1], [], []>} : vector<2x32xf32>, vector<32x32xf32>, vector<2x32xf32> -> vector<2x32xf32>
    %132 = vector.shape_cast %131 : vector<2x32xf32> to vector<2x1x32xf32>
    %133 = vector.broadcast %132 : vector<2x1x32xf32> to vector<2x8x32xf32>
    %134 = arith.addf %8, %133 : vector<2x8x32xf32>
    %cst_96 = arith.constant 0.000000e+00 : f32
    %135 = vector.broadcast %cst_96 : f32 to vector<2x8x32xf32>
    %136 = arith.maximumf %134, %135 : vector<2x8x32xf32>
    %137 = vector.shape_cast %9 : vector<1x32xf32> to vector<1x1x32xf32>
    %138 = vector.broadcast %137 : vector<1x1x32xf32> to vector<2x8x32xf32>
    %139 = arith.mulf %136, %138 : vector<2x8x32xf32>
    %cst_97 = arith.constant dense<0.000000e+00> : vector<2x8xf32>
    %140 = vector.multi_reduction <add>, %139, %cst_97 [2] : vector<2x8x32xf32> to vector<2x8xf32>
    %cst_98 = arith.constant dense<0xFF800000> : vector<2xf32>
    %141 = vector.multi_reduction <maximumf>, %140, %cst_98 [1] : vector<2x8xf32> to vector<2xf32>
    %142 = vector.shape_cast %141 : vector<2xf32> to vector<2x1xf32>
    %143 = vector.broadcast %142 : vector<2x1xf32> to vector<2x8xf32>
    %144 = arith.subf %140, %143 : vector<2x8xf32>
    %145 = math.exp %144 : vector<2x8xf32>
    %cst_99 = arith.constant dense<0.000000e+00> : vector<2xf32>
    %146 = vector.multi_reduction <add>, %145, %cst_99 [1] : vector<2x8xf32> to vector<2xf32>
    %147 = vector.shape_cast %146 : vector<2xf32> to vector<2x1xf32>
    %148 = tpu.reciprocal %147 {approx = true} : vector<2x1xf32> -> vector<2x1xf32>
    %149 = vector.broadcast %148 : vector<2x1xf32> to vector<2x8xf32>
    %150 = arith.mulf %145, %149 : vector<2x8xf32>
    %151 = vector.shape_cast %150 : vector<2x8xf32> to vector<2x8x1xf32>
    %152 = vector.broadcast %151 : vector<2x8x1xf32> to vector<2x8x64xf32>
    %153 = arith.mulf %0, %152 : vector<2x8x64xf32>
    %cst_100 = arith.constant dense<0.000000e+00> : vector<2x64xf32>
    %154 = vector.multi_reduction <add>, %153, %cst_100 [1] : vector<2x8x64xf32> to vector<2x64xf32>
    %c0_101 = arith.constant 0 : index
    %c0_102 = arith.constant 0 : index
    %155 = vector.load %arg8[%c0_101, %c0_102] : memref<64x16xf32, #tpu.memory_space<vmem>>, vector<64x16xf32>
    %cst_103 = arith.constant dense<0.000000e+00> : vector<2x16xf32>
    %156 = tpu.matmul %154, %155, %cst_103 {dimension_numbers = #tpu.dot_dimension_numbers<[1], [0], [0], [1], [0, 0, 1, 1], [], []>} : vector<2x64xf32>, vector<64x16xf32>, vector<2x16xf32> -> vector<2x16xf32>
    %c0_104 = arith.constant 0 : index
    %c0_105 = arith.constant 0 : index
    %157 = vector.load %arg9[%c0_104, %c0_105] : memref<1x16xf32, #tpu.memory_space<vmem>>, vector<1x16xf32>
    %158 = vector.broadcast %157 : vector<1x16xf32> to vector<2x16xf32>
    %159 = arith.addf %156, %158 : vector<2x16xf32>
    %c0_106 = arith.constant 0 : index
    %c0_107 = arith.constant 0 : index
    %160 = vector.load %arg6[%c0_106, %c0_107] : memref<32x16xf32, #tpu.memory_space<vmem>>, vector<32x16xf32>
    %cst_108 = arith.constant dense<0.000000e+00> : vector<2x16xf32>
    %161 = tpu.matmul %124, %160, %cst_108 {dimension_numbers = #tpu.dot_dimension_numbers<[1], [0], [0], [1], [0, 0, 1, 1], [], []>} : vector<2x32xf32>, vector<32x16xf32>, vector<2x16xf32> -> vector<2x16xf32>
    %162 = arith.addf %159, %161 : vector<2x16xf32>
    %c0_109 = arith.constant 0 : index
    %c0_110 = arith.constant 0 : index
    %163 = vector.load %arg7[%c0_109, %c0_110] : memref<32x16xf32, #tpu.memory_space<vmem>>, vector<32x16xf32>
    %cst_111 = arith.constant dense<0.000000e+00> : vector<2x16xf32>
    %164 = tpu.matmul %129, %163, %cst_111 {dimension_numbers = #tpu.dot_dimension_numbers<[1], [0], [0], [1], [0, 0, 1, 1], [], []>} : vector<2x32xf32>, vector<32x16xf32>, vector<2x16xf32> -> vector<2x16xf32>
    %165 = arith.addf %162, %164 : vector<2x16xf32>
    %cst_112 = arith.constant 0.000000e+00 : f32
    %166 = vector.broadcast %cst_112 : f32 to vector<2x16xf32>
    %167 = arith.maximumf %165, %166 : vector<2x16xf32>
    %c0_113 = arith.constant 0 : index
    %c0_114 = arith.constant 0 : index
    %168 = vector.load %arg13[%c0_113, %c0_114] : memref<64x16xf32, #tpu.memory_space<vmem>>, vector<64x16xf32>
    %cst_115 = arith.constant dense<0.000000e+00> : vector<2x16xf32>
    %169 = tpu.matmul %154, %168, %cst_115 {dimension_numbers = #tpu.dot_dimension_numbers<[1], [0], [0], [1], [0, 0, 1, 1], [], []>} : vector<2x64xf32>, vector<64x16xf32>, vector<2x16xf32> -> vector<2x16xf32>
    %c0_116 = arith.constant 0 : index
    %c0_117 = arith.constant 0 : index
    %170 = vector.load %arg15[%c0_116, %c0_117] : memref<1x16xf32, #tpu.memory_space<vmem>>, vector<1x16xf32>
    %171 = vector.broadcast %170 : vector<1x16xf32> to vector<2x16xf32>
    %172 = arith.addf %169, %171 : vector<2x16xf32>
    %c0_118 = arith.constant 0 : index
    %c0_119 = arith.constant 0 : index
    %173 = vector.load %arg14[%c0_118, %c0_119] : memref<16x16xf32, #tpu.memory_space<vmem>>, vector<16x16xf32>
    %cst_120 = arith.constant dense<0.000000e+00> : vector<2x16xf32>
    %174 = tpu.matmul %167, %173, %cst_120 {dimension_numbers = #tpu.dot_dimension_numbers<[1], [0], [0], [1], [0, 0, 1, 1], [], []>} : vector<2x16xf32>, vector<16x16xf32>, vector<2x16xf32> -> vector<2x16xf32>
    %175 = arith.addf %172, %174 : vector<2x16xf32>
    %c0_121 = arith.constant 0 : index
    %c0_122 = arith.constant 0 : index
    %176 = vector.load %arg12[%c0_121, %c0_122] : memref<32x16xf32, #tpu.memory_space<vmem>>, vector<32x16xf32>
    %cst_123 = arith.constant dense<0.000000e+00> : vector<2x16xf32>
    %177 = tpu.matmul %129, %176, %cst_123 {dimension_numbers = #tpu.dot_dimension_numbers<[1], [0], [0], [1], [0, 0, 1, 1], [], []>} : vector<2x32xf32>, vector<32x16xf32>, vector<2x16xf32> -> vector<2x16xf32>
    %178 = arith.addf %175, %177 : vector<2x16xf32>
    %cst_124 = arith.constant 0.000000e+00 : f32
    %179 = vector.broadcast %cst_124 : f32 to vector<2x16xf32>
    %180 = arith.maximumf %178, %179 : vector<2x16xf32>
    %c0_125 = arith.constant 0 : index
    %c0_126 = arith.constant 0 : index
    %181 = vector.load %arg18[%c0_125, %c0_126] : memref<16x64xf32, #tpu.memory_space<vmem>>, vector<16x64xf32>
    %cst_127 = arith.constant dense<0.000000e+00> : vector<2x64xf32>
    %182 = tpu.matmul %180, %181, %cst_127 {dimension_numbers = #tpu.dot_dimension_numbers<[1], [0], [0], [1], [0, 0, 1, 1], [], []>} : vector<2x16xf32>, vector<16x64xf32>, vector<2x64xf32> -> vector<2x64xf32>
    %c0_128 = arith.constant 0 : index
    %c0_129 = arith.constant 0 : index
    %183 = vector.load %arg19[%c0_128, %c0_129] : memref<1x64xf32, #tpu.memory_space<vmem>>, vector<1x64xf32>
    %184 = vector.broadcast %183 : vector<1x64xf32> to vector<2x64xf32>
    %185 = arith.addf %182, %184 : vector<2x64xf32>
    %c0_130 = arith.constant 0 : index
    %c128 = arith.constant 128 : index
    %186 = vector.load %arg20[%c0_130, %c128] : memref<2x384xf32, #tpu.memory_space<vmem>>, vector<2x64xf32>
    tpu.vector_store %arg20[%c0_130, %c128], %185 {strides = array<i32>} : memref<2x384xf32, #tpu.memory_space<vmem>>, vector<2x64xf32>,
    %c0_131 = arith.constant 0 : index
    %c0_132 = arith.constant 0 : index
    %187 = vector.load %arg10[%c0_131, %c0_132] : memref<16x32xf32, #tpu.memory_space<vmem>>, vector<16x32xf32>
    %cst_133 = arith.constant dense<0.000000e+00> : vector<2x32xf32>
    %188 = tpu.matmul %167, %187, %cst_133 {dimension_numbers = #tpu.dot_dimension_numbers<[1], [0], [0], [1], [0, 0, 1, 1], [], []>} : vector<2x16xf32>, vector<16x32xf32>, vector<2x32xf32> -> vector<2x32xf32>
    %c0_134 = arith.constant 0 : index
    %c0_135 = arith.constant 0 : index
    %189 = vector.load %arg11[%c0_134, %c0_135] : memref<1x32xf32, #tpu.memory_space<vmem>>, vector<1x32xf32>
    %190 = vector.broadcast %189 : vector<1x32xf32> to vector<2x32xf32>
    %191 = arith.addf %188, %190 : vector<2x32xf32>
    %c0_136 = arith.constant 0 : index
    %c0_137 = arith.constant 0 : index
    %192 = vector.load %arg16[%c0_136, %c0_137] : memref<16x32xf32, #tpu.memory_space<vmem>>, vector<16x32xf32>
    %cst_138 = arith.constant dense<0.000000e+00> : vector<2x32xf32>
    %193 = tpu.matmul %180, %192, %cst_138 {dimension_numbers = #tpu.dot_dimension_numbers<[1], [0], [0], [1], [0, 0, 1, 1], [], []>} : vector<2x16xf32>, vector<16x32xf32>, vector<2x32xf32> -> vector<2x32xf32>
    %c0_139 = arith.constant 0 : index
    %c0_140 = arith.constant 0 : index
    %194 = vector.load %arg17[%c0_139, %c0_140] : memref<1x32xf32, #tpu.memory_space<vmem>>, vector<1x32xf32>
    %195 = vector.broadcast %194 : vector<1x32xf32> to vector<2x32xf32>
    %196 = arith.addf %193, %195 : vector<2x32xf32>
    %c0_141 = arith.constant 0 : index
    %c0_142 = arith.constant 0 : index
    %197 = vector.load %arg2[%c0_141, %c0_142] : memref<32x32xf32, #tpu.memory_space<vmem>>, vector<32x32xf32>
    %cst_143 = arith.constant dense<0.000000e+00> : vector<2x32xf32>
    %198 = tpu.matmul %191, %197, %cst_143 {dimension_numbers = #tpu.dot_dimension_numbers<[1], [0], [0], [1], [0, 0, 1, 1], [], []>} : vector<2x32xf32>, vector<32x32xf32>, vector<2x32xf32> -> vector<2x32xf32>
    %199 = vector.shape_cast %198 : vector<2x32xf32> to vector<2x1x32xf32>
    %200 = vector.broadcast %199 : vector<2x1x32xf32> to vector<2x8x32xf32>
    %201 = arith.addf %8, %200 : vector<2x8x32xf32>
    %cst_144 = arith.constant 0.000000e+00 : f32
    %202 = vector.broadcast %cst_144 : f32 to vector<2x8x32xf32>
    %203 = arith.maximumf %201, %202 : vector<2x8x32xf32>
    %204 = vector.shape_cast %9 : vector<1x32xf32> to vector<1x1x32xf32>
    %205 = vector.broadcast %204 : vector<1x1x32xf32> to vector<2x8x32xf32>
    %206 = arith.mulf %203, %205 : vector<2x8x32xf32>
    %cst_145 = arith.constant dense<0.000000e+00> : vector<2x8xf32>
    %207 = vector.multi_reduction <add>, %206, %cst_145 [2] : vector<2x8x32xf32> to vector<2x8xf32>
    %cst_146 = arith.constant dense<0xFF800000> : vector<2xf32>
    %208 = vector.multi_reduction <maximumf>, %207, %cst_146 [1] : vector<2x8xf32> to vector<2xf32>
    %209 = vector.shape_cast %208 : vector<2xf32> to vector<2x1xf32>
    %210 = vector.broadcast %209 : vector<2x1xf32> to vector<2x8xf32>
    %211 = arith.subf %207, %210 : vector<2x8xf32>
    %212 = math.exp %211 : vector<2x8xf32>
    %cst_147 = arith.constant dense<0.000000e+00> : vector<2xf32>
    %213 = vector.multi_reduction <add>, %212, %cst_147 [1] : vector<2x8xf32> to vector<2xf32>
    %214 = vector.shape_cast %213 : vector<2xf32> to vector<2x1xf32>
    %215 = tpu.reciprocal %214 {approx = true} : vector<2x1xf32> -> vector<2x1xf32>
    %216 = vector.broadcast %215 : vector<2x1xf32> to vector<2x8xf32>
    %217 = arith.mulf %212, %216 : vector<2x8xf32>
    %218 = vector.shape_cast %217 : vector<2x8xf32> to vector<2x8x1xf32>
    %219 = vector.broadcast %218 : vector<2x8x1xf32> to vector<2x8x64xf32>
    %220 = arith.mulf %0, %219 : vector<2x8x64xf32>
    %cst_148 = arith.constant dense<0.000000e+00> : vector<2x64xf32>
    %221 = vector.multi_reduction <add>, %220, %cst_148 [1] : vector<2x8x64xf32> to vector<2x64xf32>
    %c0_149 = arith.constant 0 : index
    %c0_150 = arith.constant 0 : index
    %222 = vector.load %arg8[%c0_149, %c0_150] : memref<64x16xf32, #tpu.memory_space<vmem>>, vector<64x16xf32>
    %cst_151 = arith.constant dense<0.000000e+00> : vector<2x16xf32>
    %223 = tpu.matmul %221, %222, %cst_151 {dimension_numbers = #tpu.dot_dimension_numbers<[1], [0], [0], [1], [0, 0, 1, 1], [], []>} : vector<2x64xf32>, vector<64x16xf32>, vector<2x16xf32> -> vector<2x16xf32>
    %c0_152 = arith.constant 0 : index
    %c0_153 = arith.constant 0 : index
    %224 = vector.load %arg9[%c0_152, %c0_153] : memref<1x16xf32, #tpu.memory_space<vmem>>, vector<1x16xf32>
    %225 = vector.broadcast %224 : vector<1x16xf32> to vector<2x16xf32>
    %226 = arith.addf %223, %225 : vector<2x16xf32>
    %c0_154 = arith.constant 0 : index
    %c0_155 = arith.constant 0 : index
    %227 = vector.load %arg6[%c0_154, %c0_155] : memref<32x16xf32, #tpu.memory_space<vmem>>, vector<32x16xf32>
    %cst_156 = arith.constant dense<0.000000e+00> : vector<2x16xf32>
    %228 = tpu.matmul %191, %227, %cst_156 {dimension_numbers = #tpu.dot_dimension_numbers<[1], [0], [0], [1], [0, 0, 1, 1], [], []>} : vector<2x32xf32>, vector<32x16xf32>, vector<2x16xf32> -> vector<2x16xf32>
    %229 = arith.addf %226, %228 : vector<2x16xf32>
    %c0_157 = arith.constant 0 : index
    %c0_158 = arith.constant 0 : index
    %230 = vector.load %arg7[%c0_157, %c0_158] : memref<32x16xf32, #tpu.memory_space<vmem>>, vector<32x16xf32>
    %cst_159 = arith.constant dense<0.000000e+00> : vector<2x16xf32>
    %231 = tpu.matmul %196, %230, %cst_159 {dimension_numbers = #tpu.dot_dimension_numbers<[1], [0], [0], [1], [0, 0, 1, 1], [], []>} : vector<2x32xf32>, vector<32x16xf32>, vector<2x16xf32> -> vector<2x16xf32>
    %232 = arith.addf %229, %231 : vector<2x16xf32>
    %cst_160 = arith.constant 0.000000e+00 : f32
    %233 = vector.broadcast %cst_160 : f32 to vector<2x16xf32>
    %234 = arith.maximumf %232, %233 : vector<2x16xf32>
    %c0_161 = arith.constant 0 : index
    %c0_162 = arith.constant 0 : index
    %235 = vector.load %arg13[%c0_161, %c0_162] : memref<64x16xf32, #tpu.memory_space<vmem>>, vector<64x16xf32>
    %cst_163 = arith.constant dense<0.000000e+00> : vector<2x16xf32>
    %236 = tpu.matmul %221, %235, %cst_163 {dimension_numbers = #tpu.dot_dimension_numbers<[1], [0], [0], [1], [0, 0, 1, 1], [], []>} : vector<2x64xf32>, vector<64x16xf32>, vector<2x16xf32> -> vector<2x16xf32>
    %c0_164 = arith.constant 0 : index
    %c0_165 = arith.constant 0 : index
    %237 = vector.load %arg15[%c0_164, %c0_165] : memref<1x16xf32, #tpu.memory_space<vmem>>, vector<1x16xf32>
    %238 = vector.broadcast %237 : vector<1x16xf32> to vector<2x16xf32>
    %239 = arith.addf %236, %238 : vector<2x16xf32>
    %c0_166 = arith.constant 0 : index
    %c0_167 = arith.constant 0 : index
    %240 = vector.load %arg14[%c0_166, %c0_167] : memref<16x16xf32, #tpu.memory_space<vmem>>, vector<16x16xf32>
    %cst_168 = arith.constant dense<0.000000e+00> : vector<2x16xf32>
    %241 = tpu.matmul %234, %240, %cst_168 {dimension_numbers = #tpu.dot_dimension_numbers<[1], [0], [0], [1], [0, 0, 1, 1], [], []>} : vector<2x16xf32>, vector<16x16xf32>, vector<2x16xf32> -> vector<2x16xf32>
    %242 = arith.addf %239, %241 : vector<2x16xf32>
    %c0_169 = arith.constant 0 : index
    %c0_170 = arith.constant 0 : index
    %243 = vector.load %arg12[%c0_169, %c0_170] : memref<32x16xf32, #tpu.memory_space<vmem>>, vector<32x16xf32>
    %cst_171 = arith.constant dense<0.000000e+00> : vector<2x16xf32>
    %244 = tpu.matmul %196, %243, %cst_171 {dimension_numbers = #tpu.dot_dimension_numbers<[1], [0], [0], [1], [0, 0, 1, 1], [], []>} : vector<2x32xf32>, vector<32x16xf32>, vector<2x16xf32> -> vector<2x16xf32>
    %245 = arith.addf %242, %244 : vector<2x16xf32>
    %cst_172 = arith.constant 0.000000e+00 : f32
    %246 = vector.broadcast %cst_172 : f32 to vector<2x16xf32>
    %247 = arith.maximumf %245, %246 : vector<2x16xf32>
    %c0_173 = arith.constant 0 : index
    %c0_174 = arith.constant 0 : index
    %248 = vector.load %arg18[%c0_173, %c0_174] : memref<16x64xf32, #tpu.memory_space<vmem>>, vector<16x64xf32>
    %cst_175 = arith.constant dense<0.000000e+00> : vector<2x64xf32>
    %249 = tpu.matmul %247, %248, %cst_175 {dimension_numbers = #tpu.dot_dimension_numbers<[1], [0], [0], [1], [0, 0, 1, 1], [], []>} : vector<2x16xf32>, vector<16x64xf32>, vector<2x64xf32> -> vector<2x64xf32>
    %c0_176 = arith.constant 0 : index
    %c0_177 = arith.constant 0 : index
    %250 = vector.load %arg19[%c0_176, %c0_177] : memref<1x64xf32, #tpu.memory_space<vmem>>, vector<1x64xf32>
    %251 = vector.broadcast %250 : vector<1x64xf32> to vector<2x64xf32>
    %252 = arith.addf %249, %251 : vector<2x64xf32>
    %c0_178 = arith.constant 0 : index
    %c192 = arith.constant 192 : index
    %253 = vector.load %arg20[%c0_178, %c192] : memref<2x384xf32, #tpu.memory_space<vmem>>, vector<2x64xf32>
    tpu.vector_store %arg20[%c0_178, %c192], %252 {strides = array<i32>} : memref<2x384xf32, #tpu.memory_space<vmem>>, vector<2x64xf32>,
    %c0_179 = arith.constant 0 : index
    %c0_180 = arith.constant 0 : index
    %254 = vector.load %arg10[%c0_179, %c0_180] : memref<16x32xf32, #tpu.memory_space<vmem>>, vector<16x32xf32>
    %cst_181 = arith.constant dense<0.000000e+00> : vector<2x32xf32>
    %255 = tpu.matmul %234, %254, %cst_181 {dimension_numbers = #tpu.dot_dimension_numbers<[1], [0], [0], [1], [0, 0, 1, 1], [], []>} : vector<2x16xf32>, vector<16x32xf32>, vector<2x32xf32> -> vector<2x32xf32>
    %c0_182 = arith.constant 0 : index
    %c0_183 = arith.constant 0 : index
    %256 = vector.load %arg11[%c0_182, %c0_183] : memref<1x32xf32, #tpu.memory_space<vmem>>, vector<1x32xf32>
    %257 = vector.broadcast %256 : vector<1x32xf32> to vector<2x32xf32>
    %258 = arith.addf %255, %257 : vector<2x32xf32>
    %c0_184 = arith.constant 0 : index
    %c0_185 = arith.constant 0 : index
    %259 = vector.load %arg16[%c0_184, %c0_185] : memref<16x32xf32, #tpu.memory_space<vmem>>, vector<16x32xf32>
    %cst_186 = arith.constant dense<0.000000e+00> : vector<2x32xf32>
    %260 = tpu.matmul %247, %259, %cst_186 {dimension_numbers = #tpu.dot_dimension_numbers<[1], [0], [0], [1], [0, 0, 1, 1], [], []>} : vector<2x16xf32>, vector<16x32xf32>, vector<2x32xf32> -> vector<2x32xf32>
    %c0_187 = arith.constant 0 : index
    %c0_188 = arith.constant 0 : index
    %261 = vector.load %arg17[%c0_187, %c0_188] : memref<1x32xf32, #tpu.memory_space<vmem>>, vector<1x32xf32>
    %262 = vector.broadcast %261 : vector<1x32xf32> to vector<2x32xf32>
    %263 = arith.addf %260, %262 : vector<2x32xf32>
    %c0_189 = arith.constant 0 : index
    %c0_190 = arith.constant 0 : index
    %264 = vector.load %arg2[%c0_189, %c0_190] : memref<32x32xf32, #tpu.memory_space<vmem>>, vector<32x32xf32>
    %cst_191 = arith.constant dense<0.000000e+00> : vector<2x32xf32>
    %265 = tpu.matmul %258, %264, %cst_191 {dimension_numbers = #tpu.dot_dimension_numbers<[1], [0], [0], [1], [0, 0, 1, 1], [], []>} : vector<2x32xf32>, vector<32x32xf32>, vector<2x32xf32> -> vector<2x32xf32>
    %266 = vector.shape_cast %265 : vector<2x32xf32> to vector<2x1x32xf32>
    %267 = vector.broadcast %266 : vector<2x1x32xf32> to vector<2x8x32xf32>
    %268 = arith.addf %8, %267 : vector<2x8x32xf32>
    %cst_192 = arith.constant 0.000000e+00 : f32
    %269 = vector.broadcast %cst_192 : f32 to vector<2x8x32xf32>
    %270 = arith.maximumf %268, %269 : vector<2x8x32xf32>
    %271 = vector.shape_cast %9 : vector<1x32xf32> to vector<1x1x32xf32>
    %272 = vector.broadcast %271 : vector<1x1x32xf32> to vector<2x8x32xf32>
    %273 = arith.mulf %270, %272 : vector<2x8x32xf32>
    %cst_193 = arith.constant dense<0.000000e+00> : vector<2x8xf32>
    %274 = vector.multi_reduction <add>, %273, %cst_193 [2] : vector<2x8x32xf32> to vector<2x8xf32>
    %cst_194 = arith.constant dense<0xFF800000> : vector<2xf32>
    %275 = vector.multi_reduction <maximumf>, %274, %cst_194 [1] : vector<2x8xf32> to vector<2xf32>
    %276 = vector.shape_cast %275 : vector<2xf32> to vector<2x1xf32>
    %277 = vector.broadcast %276 : vector<2x1xf32> to vector<2x8xf32>
    %278 = arith.subf %274, %277 : vector<2x8xf32>
    %279 = math.exp %278 : vector<2x8xf32>
    %cst_195 = arith.constant dense<0.000000e+00> : vector<2xf32>
    %280 = vector.multi_reduction <add>, %279, %cst_195 [1] : vector<2x8xf32> to vector<2xf32>
    %281 = vector.shape_cast %280 : vector<2xf32> to vector<2x1xf32>
    %282 = tpu.reciprocal %281 {approx = true} : vector<2x1xf32> -> vector<2x1xf32>
    %283 = vector.broadcast %282 : vector<2x1xf32> to vector<2x8xf32>
    %284 = arith.mulf %279, %283 : vector<2x8xf32>
    %285 = vector.shape_cast %284 : vector<2x8xf32> to vector<2x8x1xf32>
    %286 = vector.broadcast %285 : vector<2x8x1xf32> to vector<2x8x64xf32>
    %287 = arith.mulf %0, %286 : vector<2x8x64xf32>
    %cst_196 = arith.constant dense<0.000000e+00> : vector<2x64xf32>
    %288 = vector.multi_reduction <add>, %287, %cst_196 [1] : vector<2x8x64xf32> to vector<2x64xf32>
    %c0_197 = arith.constant 0 : index
    %c0_198 = arith.constant 0 : index
    %289 = vector.load %arg8[%c0_197, %c0_198] : memref<64x16xf32, #tpu.memory_space<vmem>>, vector<64x16xf32>
    %cst_199 = arith.constant dense<0.000000e+00> : vector<2x16xf32>
    %290 = tpu.matmul %288, %289, %cst_199 {dimension_numbers = #tpu.dot_dimension_numbers<[1], [0], [0], [1], [0, 0, 1, 1], [], []>} : vector<2x64xf32>, vector<64x16xf32>, vector<2x16xf32> -> vector<2x16xf32>
    %c0_200 = arith.constant 0 : index
    %c0_201 = arith.constant 0 : index
    %291 = vector.load %arg9[%c0_200, %c0_201] : memref<1x16xf32, #tpu.memory_space<vmem>>, vector<1x16xf32>
    %292 = vector.broadcast %291 : vector<1x16xf32> to vector<2x16xf32>
    %293 = arith.addf %290, %292 : vector<2x16xf32>
    %c0_202 = arith.constant 0 : index
    %c0_203 = arith.constant 0 : index
    %294 = vector.load %arg6[%c0_202, %c0_203] : memref<32x16xf32, #tpu.memory_space<vmem>>, vector<32x16xf32>
    %cst_204 = arith.constant dense<0.000000e+00> : vector<2x16xf32>
    %295 = tpu.matmul %258, %294, %cst_204 {dimension_numbers = #tpu.dot_dimension_numbers<[1], [0], [0], [1], [0, 0, 1, 1], [], []>} : vector<2x32xf32>, vector<32x16xf32>, vector<2x16xf32> -> vector<2x16xf32>
    %296 = arith.addf %293, %295 : vector<2x16xf32>
    %c0_205 = arith.constant 0 : index
    %c0_206 = arith.constant 0 : index
    %297 = vector.load %arg7[%c0_205, %c0_206] : memref<32x16xf32, #tpu.memory_space<vmem>>, vector<32x16xf32>
    %cst_207 = arith.constant dense<0.000000e+00> : vector<2x16xf32>
    %298 = tpu.matmul %263, %297, %cst_207 {dimension_numbers = #tpu.dot_dimension_numbers<[1], [0], [0], [1], [0, 0, 1, 1], [], []>} : vector<2x32xf32>, vector<32x16xf32>, vector<2x16xf32> -> vector<2x16xf32>
    %299 = arith.addf %296, %298 : vector<2x16xf32>
    %cst_208 = arith.constant 0.000000e+00 : f32
    %300 = vector.broadcast %cst_208 : f32 to vector<2x16xf32>
    %301 = arith.maximumf %299, %300 : vector<2x16xf32>
    %c0_209 = arith.constant 0 : index
    %c0_210 = arith.constant 0 : index
    %302 = vector.load %arg13[%c0_209, %c0_210] : memref<64x16xf32, #tpu.memory_space<vmem>>, vector<64x16xf32>
    %cst_211 = arith.constant dense<0.000000e+00> : vector<2x16xf32>
    %303 = tpu.matmul %288, %302, %cst_211 {dimension_numbers = #tpu.dot_dimension_numbers<[1], [0], [0], [1], [0, 0, 1, 1], [], []>} : vector<2x64xf32>, vector<64x16xf32>, vector<2x16xf32> -> vector<2x16xf32>
    %c0_212 = arith.constant 0 : index
    %c0_213 = arith.constant 0 : index
    %304 = vector.load %arg15[%c0_212, %c0_213] : memref<1x16xf32, #tpu.memory_space<vmem>>, vector<1x16xf32>
    %305 = vector.broadcast %304 : vector<1x16xf32> to vector<2x16xf32>
    %306 = arith.addf %303, %305 : vector<2x16xf32>
    %c0_214 = arith.constant 0 : index
    %c0_215 = arith.constant 0 : index
    %307 = vector.load %arg14[%c0_214, %c0_215] : memref<16x16xf32, #tpu.memory_space<vmem>>, vector<16x16xf32>
    %cst_216 = arith.constant dense<0.000000e+00> : vector<2x16xf32>
    %308 = tpu.matmul %301, %307, %cst_216 {dimension_numbers = #tpu.dot_dimension_numbers<[1], [0], [0], [1], [0, 0, 1, 1], [], []>} : vector<2x16xf32>, vector<16x16xf32>, vector<2x16xf32> -> vector<2x16xf32>
    %309 = arith.addf %306, %308 : vector<2x16xf32>
    %c0_217 = arith.constant 0 : index
    %c0_218 = arith.constant 0 : index
    %310 = vector.load %arg12[%c0_217, %c0_218] : memref<32x16xf32, #tpu.memory_space<vmem>>, vector<32x16xf32>
    %cst_219 = arith.constant dense<0.000000e+00> : vector<2x16xf32>
    %311 = tpu.matmul %263, %310, %cst_219 {dimension_numbers = #tpu.dot_dimension_numbers<[1], [0], [0], [1], [0, 0, 1, 1], [], []>} : vector<2x32xf32>, vector<32x16xf32>, vector<2x16xf32> -> vector<2x16xf32>
    %312 = arith.addf %309, %311 : vector<2x16xf32>
    %cst_220 = arith.constant 0.000000e+00 : f32
    %313 = vector.broadcast %cst_220 : f32 to vector<2x16xf32>
    %314 = arith.maximumf %312, %313 : vector<2x16xf32>
    %c0_221 = arith.constant 0 : index
    %c0_222 = arith.constant 0 : index
    %315 = vector.load %arg18[%c0_221, %c0_222] : memref<16x64xf32, #tpu.memory_space<vmem>>, vector<16x64xf32>
    %cst_223 = arith.constant dense<0.000000e+00> : vector<2x64xf32>
    %316 = tpu.matmul %314, %315, %cst_223 {dimension_numbers = #tpu.dot_dimension_numbers<[1], [0], [0], [1], [0, 0, 1, 1], [], []>} : vector<2x16xf32>, vector<16x64xf32>, vector<2x64xf32> -> vector<2x64xf32>
    %c0_224 = arith.constant 0 : index
    %c0_225 = arith.constant 0 : index
    %317 = vector.load %arg19[%c0_224, %c0_225] : memref<1x64xf32, #tpu.memory_space<vmem>>, vector<1x64xf32>
    %318 = vector.broadcast %317 : vector<1x64xf32> to vector<2x64xf32>
    %319 = arith.addf %316, %318 : vector<2x64xf32>
    %c0_226 = arith.constant 0 : index
    %c256 = arith.constant 256 : index
    %320 = vector.load %arg20[%c0_226, %c256] : memref<2x384xf32, #tpu.memory_space<vmem>>, vector<2x64xf32>
    tpu.vector_store %arg20[%c0_226, %c256], %319 {strides = array<i32>} : memref<2x384xf32, #tpu.memory_space<vmem>>, vector<2x64xf32>,
    %c0_227 = arith.constant 0 : index
    %c0_228 = arith.constant 0 : index
    %321 = vector.load %arg10[%c0_227, %c0_228] : memref<16x32xf32, #tpu.memory_space<vmem>>, vector<16x32xf32>
    %cst_229 = arith.constant dense<0.000000e+00> : vector<2x32xf32>
    %322 = tpu.matmul %301, %321, %cst_229 {dimension_numbers = #tpu.dot_dimension_numbers<[1], [0], [0], [1], [0, 0, 1, 1], [], []>} : vector<2x16xf32>, vector<16x32xf32>, vector<2x32xf32> -> vector<2x32xf32>
    %c0_230 = arith.constant 0 : index
    %c0_231 = arith.constant 0 : index
    %323 = vector.load %arg11[%c0_230, %c0_231] : memref<1x32xf32, #tpu.memory_space<vmem>>, vector<1x32xf32>
    %324 = vector.broadcast %323 : vector<1x32xf32> to vector<2x32xf32>
    %325 = arith.addf %322, %324 : vector<2x32xf32>
    %c0_232 = arith.constant 0 : index
    %c0_233 = arith.constant 0 : index
    %326 = vector.load %arg16[%c0_232, %c0_233] : memref<16x32xf32, #tpu.memory_space<vmem>>, vector<16x32xf32>
    %cst_234 = arith.constant dense<0.000000e+00> : vector<2x32xf32>
    %327 = tpu.matmul %314, %326, %cst_234 {dimension_numbers = #tpu.dot_dimension_numbers<[1], [0], [0], [1], [0, 0, 1, 1], [], []>} : vector<2x16xf32>, vector<16x32xf32>, vector<2x32xf32> -> vector<2x32xf32>
    %c0_235 = arith.constant 0 : index
    %c0_236 = arith.constant 0 : index
    %328 = vector.load %arg17[%c0_235, %c0_236] : memref<1x32xf32, #tpu.memory_space<vmem>>, vector<1x32xf32>
    %329 = vector.broadcast %328 : vector<1x32xf32> to vector<2x32xf32>
    %330 = arith.addf %327, %329 : vector<2x32xf32>
    %c0_237 = arith.constant 0 : index
    %c0_238 = arith.constant 0 : index
    %331 = vector.load %arg2[%c0_237, %c0_238] : memref<32x32xf32, #tpu.memory_space<vmem>>, vector<32x32xf32>
    %cst_239 = arith.constant dense<0.000000e+00> : vector<2x32xf32>
    %332 = tpu.matmul %325, %331, %cst_239 {dimension_numbers = #tpu.dot_dimension_numbers<[1], [0], [0], [1], [0, 0, 1, 1], [], []>} : vector<2x32xf32>, vector<32x32xf32>, vector<2x32xf32> -> vector<2x32xf32>
    %333 = vector.shape_cast %332 : vector<2x32xf32> to vector<2x1x32xf32>
    %334 = vector.broadcast %333 : vector<2x1x32xf32> to vector<2x8x32xf32>
    %335 = arith.addf %8, %334 : vector<2x8x32xf32>
    %cst_240 = arith.constant 0.000000e+00 : f32
    %336 = vector.broadcast %cst_240 : f32 to vector<2x8x32xf32>
    %337 = arith.maximumf %335, %336 : vector<2x8x32xf32>
    %338 = vector.shape_cast %9 : vector<1x32xf32> to vector<1x1x32xf32>
    %339 = vector.broadcast %338 : vector<1x1x32xf32> to vector<2x8x32xf32>
    %340 = arith.mulf %337, %339 : vector<2x8x32xf32>
    %cst_241 = arith.constant dense<0.000000e+00> : vector<2x8xf32>
    %341 = vector.multi_reduction <add>, %340, %cst_241 [2] : vector<2x8x32xf32> to vector<2x8xf32>
    %cst_242 = arith.constant dense<0xFF800000> : vector<2xf32>
    %342 = vector.multi_reduction <maximumf>, %341, %cst_242 [1] : vector<2x8xf32> to vector<2xf32>
    %343 = vector.shape_cast %342 : vector<2xf32> to vector<2x1xf32>
    %344 = vector.broadcast %343 : vector<2x1xf32> to vector<2x8xf32>
    %345 = arith.subf %341, %344 : vector<2x8xf32>
    %346 = math.exp %345 : vector<2x8xf32>
    %cst_243 = arith.constant dense<0.000000e+00> : vector<2xf32>
    %347 = vector.multi_reduction <add>, %346, %cst_243 [1] : vector<2x8xf32> to vector<2xf32>
    %348 = vector.shape_cast %347 : vector<2xf32> to vector<2x1xf32>
    %349 = tpu.reciprocal %348 {approx = true} : vector<2x1xf32> -> vector<2x1xf32>
    %350 = vector.broadcast %349 : vector<2x1xf32> to vector<2x8xf32>
    %351 = arith.mulf %346, %350 : vector<2x8xf32>
    %352 = vector.shape_cast %351 : vector<2x8xf32> to vector<2x8x1xf32>
    %353 = vector.broadcast %352 : vector<2x8x1xf32> to vector<2x8x64xf32>
    %354 = arith.mulf %0, %353 : vector<2x8x64xf32>
    %cst_244 = arith.constant dense<0.000000e+00> : vector<2x64xf32>
    %355 = vector.multi_reduction <add>, %354, %cst_244 [1] : vector<2x8x64xf32> to vector<2x64xf32>
    %c0_245 = arith.constant 0 : index
    %c0_246 = arith.constant 0 : index
    %356 = vector.load %arg8[%c0_245, %c0_246] : memref<64x16xf32, #tpu.memory_space<vmem>>, vector<64x16xf32>
    %cst_247 = arith.constant dense<0.000000e+00> : vector<2x16xf32>
    %357 = tpu.matmul %355, %356, %cst_247 {dimension_numbers = #tpu.dot_dimension_numbers<[1], [0], [0], [1], [0, 0, 1, 1], [], []>} : vector<2x64xf32>, vector<64x16xf32>, vector<2x16xf32> -> vector<2x16xf32>
    %c0_248 = arith.constant 0 : index
    %c0_249 = arith.constant 0 : index
    %358 = vector.load %arg9[%c0_248, %c0_249] : memref<1x16xf32, #tpu.memory_space<vmem>>, vector<1x16xf32>
    %359 = vector.broadcast %358 : vector<1x16xf32> to vector<2x16xf32>
    %360 = arith.addf %357, %359 : vector<2x16xf32>
    %c0_250 = arith.constant 0 : index
    %c0_251 = arith.constant 0 : index
    %361 = vector.load %arg6[%c0_250, %c0_251] : memref<32x16xf32, #tpu.memory_space<vmem>>, vector<32x16xf32>
    %cst_252 = arith.constant dense<0.000000e+00> : vector<2x16xf32>
    %362 = tpu.matmul %325, %361, %cst_252 {dimension_numbers = #tpu.dot_dimension_numbers<[1], [0], [0], [1], [0, 0, 1, 1], [], []>} : vector<2x32xf32>, vector<32x16xf32>, vector<2x16xf32> -> vector<2x16xf32>
    %363 = arith.addf %360, %362 : vector<2x16xf32>
    %c0_253 = arith.constant 0 : index
    %c0_254 = arith.constant 0 : index
    %364 = vector.load %arg7[%c0_253, %c0_254] : memref<32x16xf32, #tpu.memory_space<vmem>>, vector<32x16xf32>
    %cst_255 = arith.constant dense<0.000000e+00> : vector<2x16xf32>
    %365 = tpu.matmul %330, %364, %cst_255 {dimension_numbers = #tpu.dot_dimension_numbers<[1], [0], [0], [1], [0, 0, 1, 1], [], []>} : vector<2x32xf32>, vector<32x16xf32>, vector<2x16xf32> -> vector<2x16xf32>
    %366 = arith.addf %363, %365 : vector<2x16xf32>
    %cst_256 = arith.constant 0.000000e+00 : f32
    %367 = vector.broadcast %cst_256 : f32 to vector<2x16xf32>
    %368 = arith.maximumf %366, %367 : vector<2x16xf32>
    %c0_257 = arith.constant 0 : index
    %c0_258 = arith.constant 0 : index
    %369 = vector.load %arg13[%c0_257, %c0_258] : memref<64x16xf32, #tpu.memory_space<vmem>>, vector<64x16xf32>
    %cst_259 = arith.constant dense<0.000000e+00> : vector<2x16xf32>
    %370 = tpu.matmul %355, %369, %cst_259 {dimension_numbers = #tpu.dot_dimension_numbers<[1], [0], [0], [1], [0, 0, 1, 1], [], []>} : vector<2x64xf32>, vector<64x16xf32>, vector<2x16xf32> -> vector<2x16xf32>
    %c0_260 = arith.constant 0 : index
    %c0_261 = arith.constant 0 : index
    %371 = vector.load %arg15[%c0_260, %c0_261] : memref<1x16xf32, #tpu.memory_space<vmem>>, vector<1x16xf32>
    %372 = vector.broadcast %371 : vector<1x16xf32> to vector<2x16xf32>
    %373 = arith.addf %370, %372 : vector<2x16xf32>
    %c0_262 = arith.constant 0 : index
    %c0_263 = arith.constant 0 : index
    %374 = vector.load %arg14[%c0_262, %c0_263] : memref<16x16xf32, #tpu.memory_space<vmem>>, vector<16x16xf32>
    %cst_264 = arith.constant dense<0.000000e+00> : vector<2x16xf32>
    %375 = tpu.matmul %368, %374, %cst_264 {dimension_numbers = #tpu.dot_dimension_numbers<[1], [0], [0], [1], [0, 0, 1, 1], [], []>} : vector<2x16xf32>, vector<16x16xf32>, vector<2x16xf32> -> vector<2x16xf32>
    %376 = arith.addf %373, %375 : vector<2x16xf32>
    %c0_265 = arith.constant 0 : index
    %c0_266 = arith.constant 0 : index
    %377 = vector.load %arg12[%c0_265, %c0_266] : memref<32x16xf32, #tpu.memory_space<vmem>>, vector<32x16xf32>
    %cst_267 = arith.constant dense<0.000000e+00> : vector<2x16xf32>
    %378 = tpu.matmul %330, %377, %cst_267 {dimension_numbers = #tpu.dot_dimension_numbers<[1], [0], [0], [1], [0, 0, 1, 1], [], []>} : vector<2x32xf32>, vector<32x16xf32>, vector<2x16xf32> -> vector<2x16xf32>
    %379 = arith.addf %376, %378 : vector<2x16xf32>
    %cst_268 = arith.constant 0.000000e+00 : f32
    %380 = vector.broadcast %cst_268 : f32 to vector<2x16xf32>
    %381 = arith.maximumf %379, %380 : vector<2x16xf32>
    %c0_269 = arith.constant 0 : index
    %c0_270 = arith.constant 0 : index
    %382 = vector.load %arg18[%c0_269, %c0_270] : memref<16x64xf32, #tpu.memory_space<vmem>>, vector<16x64xf32>
    %cst_271 = arith.constant dense<0.000000e+00> : vector<2x64xf32>
    %383 = tpu.matmul %381, %382, %cst_271 {dimension_numbers = #tpu.dot_dimension_numbers<[1], [0], [0], [1], [0, 0, 1, 1], [], []>} : vector<2x16xf32>, vector<16x64xf32>, vector<2x64xf32> -> vector<2x64xf32>
    %c0_272 = arith.constant 0 : index
    %c0_273 = arith.constant 0 : index
    %384 = vector.load %arg19[%c0_272, %c0_273] : memref<1x64xf32, #tpu.memory_space<vmem>>, vector<1x64xf32>
    %385 = vector.broadcast %384 : vector<1x64xf32> to vector<2x64xf32>
    %386 = arith.addf %383, %385 : vector<2x64xf32>
    %c0_274 = arith.constant 0 : index
    %c320 = arith.constant 320 : index
    %387 = vector.load %arg20[%c0_274, %c320] : memref<2x384xf32, #tpu.memory_space<vmem>>, vector<2x64xf32>
    tpu.vector_store %arg20[%c0_274, %c320], %386 {strides = array<i32>} : memref<2x384xf32, #tpu.memory_space<vmem>>, vector<2x64xf32>,
    return
  }
  func.func @transform_0(%arg0: i32) -> (i32, i32, i32) {
    %c0_i32 = arith.constant 0 : i32
    %c0_i32_0 = arith.constant 0 : i32
    %c0_i32_1 = arith.constant 0 : i32
    %c0_i32_2 = arith.constant 0 : i32
    return %c0_i32, %c0_i32_0, %c0_i32_1 : i32, i32, i32
  }
  func.func @transform_1(%arg0: i32) -> (i32, i32) {
    %c0_i32 = arith.constant 0 : i32
    %c0_i32_0 = arith.constant 0 : i32
    %c0_i32_1 = arith.constant 0 : i32
    return %c0_i32, %c0_i32_0 : i32, i32
  }
  func.func @transform_2(%arg0: i32) -> (i32, i32) {
    %c0_i32 = arith.constant 0 : i32
    %c0_i32_0 = arith.constant 0 : i32
    %c0_i32_1 = arith.constant 0 : i32
    return %c0_i32, %c0_i32_0 : i32, i32
  }
  func.func @transform_3(%arg0: i32) -> (i32, i32) {
    %c0_i32 = arith.constant 0 : i32
    %c0_i32_0 = arith.constant 0 : i32
    %c0_i32_1 = arith.constant 0 : i32
    return %c0_i32, %c0_i32_0 : i32, i32
  }
  func.func @transform_4(%arg0: i32) -> (i32, i32) {
    %c0_i32 = arith.constant 0 : i32
    %c0_i32_0 = arith.constant 0 : i32
    %c0_i32_1 = arith.constant 0 : i32
    return %c0_i32, %c0_i32_0 : i32, i32
  }
  func.func @transform_5(%arg0: i32) -> (i32, i32) {
    %c0_i32 = arith.constant 0 : i32
    %c0_i32_0 = arith.constant 0 : i32
    %c0_i32_1 = arith.constant 0 : i32
    return %c0_i32, %c0_i32_0 : i32, i32
  }
  func.func @transform_6(%arg0: i32) -> (i32, i32) {
    %c0_i32 = arith.constant 0 : i32
    %c0_i32_0 = arith.constant 0 : i32
    %c0_i32_1 = arith.constant 0 : i32
    return %c0_i32, %c0_i32_0 : i32, i32
  }
  func.func @transform_7(%arg0: i32) -> (i32, i32) {
    %c0_i32 = arith.constant 0 : i32
    %c0_i32_0 = arith.constant 0 : i32
    %c0_i32_1 = arith.constant 0 : i32
    return %c0_i32, %c0_i32_0 : i32, i32
  }
  func.func @transform_8(%arg0: i32) -> (i32, i32) {
    %c0_i32 = arith.constant 0 : i32
    %c0_i32_0 = arith.constant 0 : i32
    %c0_i32_1 = arith.constant 0 : i32
    return %c0_i32, %c0_i32_0 : i32, i32
  }
  func.func @transform_9(%arg0: i32) -> (i32, i32) {
    %c0_i32 = arith.constant 0 : i32
    %c0_i32_0 = arith.constant 0 : i32
    %c0_i32_1 = arith.constant 0 : i32
    return %c0_i32, %c0_i32_0 : i32, i32
  }
  func.func @transform_10(%arg0: i32) -> (i32, i32) {
    %c0_i32 = arith.constant 0 : i32
    %c0_i32_0 = arith.constant 0 : i32
    %c0_i32_1 = arith.constant 0 : i32
    return %c0_i32, %c0_i32_0 : i32, i32
  }
  func.func @transform_11(%arg0: i32) -> (i32, i32) {
    %c0_i32 = arith.constant 0 : i32
    %c0_i32_0 = arith.constant 0 : i32
    %c0_i32_1 = arith.constant 0 : i32
    return %c0_i32, %c0_i32_0 : i32, i32
  }
  func.func @transform_12(%arg0: i32) -> (i32, i32) {
    %c0_i32 = arith.constant 0 : i32
    %c0_i32_0 = arith.constant 0 : i32
    %c0_i32_1 = arith.constant 0 : i32
    return %c0_i32, %c0_i32_0 : i32, i32
  }
  func.func @transform_13(%arg0: i32) -> (i32, i32) {
    %c0_i32 = arith.constant 0 : i32
    %c0_i32_0 = arith.constant 0 : i32
    %c0_i32_1 = arith.constant 0 : i32
    return %c0_i32, %c0_i32_0 : i32, i32
  }
  func.func @transform_14(%arg0: i32) -> (i32, i32) {
    %c0_i32 = arith.constant 0 : i32
    %c0_i32_0 = arith.constant 0 : i32
    %c0_i32_1 = arith.constant 0 : i32
    return %c0_i32, %c0_i32_0 : i32, i32
  }
  func.func @transform_15(%arg0: i32) -> (i32, i32) {
    %c0_i32 = arith.constant 0 : i32
    %c0_i32_0 = arith.constant 0 : i32
    %c0_i32_1 = arith.constant 0 : i32
    return %c0_i32, %c0_i32_0 : i32, i32
  }
  func.func @transform_16(%arg0: i32) -> (i32, i32) {
    %c0_i32 = arith.constant 0 : i32
    %c0_i32_0 = arith.constant 0 : i32
    %c0_i32_1 = arith.constant 0 : i32
    return %c0_i32, %c0_i32_0 : i32, i32
  }
  func.func @transform_17(%arg0: i32) -> (i32, i32) {
    %c0_i32 = arith.constant 0 : i32
    %c0_i32_0 = arith.constant 0 : i32
    %c0_i32_1 = arith.constant 0 : i32
    return %c0_i32, %c0_i32_0 : i32, i32
  }
  func.func @transform_18(%arg0: i32) -> (i32, i32) {
    %c0_i32 = arith.constant 0 : i32
    %c0_i32_0 = arith.constant 0 : i32
    %c0_i32_1 = arith.constant 0 : i32
    return %c0_i32, %c0_i32_0 : i32, i32
  }
  func.func @transform_19(%arg0: i32) -> (i32, i32) {
    %c0_i32 = arith.constant 0 : i32
    %c0_i32_0 = arith.constant 0 : i32
    %c0_i32_1 = arith.constant 0 : i32
    return %c0_i32, %c0_i32_0 : i32, i32
  }
}

</mosaic_0001>

<bundles_post_ra>
// kernel: tpu_custom_call.1
= control target key start
LH: loop header
LB: loop body
LE: loop exit
PB: predicated region body
PF: predicated region fallthrough
CT: control target
= control target key end

     0   :  { %s3399_s0 = inlined_call_operand.vmem [shape: f32[2,8,64], index: 0, kind: input, shape index: {}]   ;;  %s3400_s1 = inlined_call_operand.vmem [shape: f32[32,32], index: 1, kind: input, shape index: {}]   ;;  %s3401_s2 = inlined_call_operand.vmem [shape: f32[64,32], index: 2, kind: input, shape index: {}]   ;;  %s3402_s3 = inlined_call_operand.vmem [shape: f32[1,32], index: 3, kind: input, shape index: {}]   ;;  %s3403_s4 = inlined_call_operand.vmem [shape: f32[1,32], index: 4, kind: input, shape index: {}]   ;;  %s3404_s5 = inlined_call_operand.vmem [shape: f32[32,16], index: 5, kind: input, shape index: {}]   ;;  %s3405_s6 = inlined_call_operand.vmem [shape: f32[32,16], index: 6, kind: input, shape index: {}]   ;;  %s3406_s7 = inlined_call_operand.vmem [shape: f32[64,16], index: 7, kind: input, shape index: {}]   ;;  %s3407_s8 = inlined_call_operand.vmem [shape: f32[1,16], index: 8, kind: input, shape index: {}]   ;;  %s3408_s9 = inlined_call_operand.vmem [shape: f32[16,32], index: 9, kind: input, shape index: {}]   ;;  %s3409_s10 = inlined_call_operand.vmem [shape: f32[1,32], index: 10, kind: input, shape index: {}]   ;;  %s3410_s11 = inlined_call_operand.vmem [shape: f32[32,16], index: 11, kind: input, shape index: {}]   ;;  %s3411_s12 = inlined_call_operand.vmem [shape: f32[64,16], index: 12, kind: input, shape index: {}]   ;;  %s3412_s13 = inlined_call_operand.vmem [shape: f32[16,16], index: 13, kind: input, shape index: {}]   ;;  %s3413_s14 = inlined_call_operand.vmem [shape: f32[1,16], index: 14, kind: input, shape index: {}]   ;;  %s3414_s15 = inlined_call_operand.vmem [shape: f32[16,32], index: 15, kind: input, shape index: {}]   ;;  %s3415_s16 = inlined_call_operand.vmem [shape: f32[1,32], index: 16, kind: input, shape index: {}]   ;;  %s3416_s17 = inlined_call_operand.vmem [shape: f32[16,64], index: 17, kind: input, shape index: {}]   ;;  %s3417_s18 = inlined_call_operand.vmem [shape: f32[1,64], index: 18, kind: input, shape index: {}]   ;;  %s3418_s19 = inlined_call_operand.hbm [shape: f32[2,384], index: 19, kind: output, shape index: {}]  }
   0x1   :  { %3422 = sst [smem:[#allocation5_spill]] %s3399_s0 }
   0x2   :  { %3423 = sst [smem:[#allocation6_spill]] %s3400_s1 }
   0x3   :  { %3424 = sst [smem:[#allocation7_spill]] %s3401_s2 }
   0x4   :  { %3425 = sst [smem:[#allocation8_spill]] %s3402_s3 }
   0x5   :  { %s3426_s20 = sld [smem:[#allocation7_spill]]  ;;  %vm73_vm0 = vcmask 523264  }
   0x6   :  { %s3427_s22 = sld [smem:[#allocation5_spill]] }
   0xb   :  { %v72_v0 = vld [vmem:[%s3426_s20 + $0x38] sm:$0xff]  ;;  %v71_v1 = vld [vmem:[%s3426_s20 + $0x30] sm:$0xff]  ;;  %v70_v2 = vld [vmem:[%s3426_s20 + $0x28] sm:$0xff] }
   0xc   :  { %88 = vmatpush.msra.mxu0 %v72_v0  ;;  %v69_v3 = vld [vmem:[%s3426_s20 + $0x20] sm:$0xff]  ;;  %v68_v4 = vld [vmem:[%s3426_s20 + $0x18] sm:$0xff]  ;;  %v67_v5 = vld [vmem:[%s3426_s20 + $0x10] sm:$0xff] }
   0xd   :  { %v66_v6 = vld [vmem:[%s3426_s20 + $0x8] sm:$0xff]  ;;  %v65_v7 = vld [vmem:[%s3426_s20] sm:$0xff] }
   0xe   :  { %89 = vmatpush.msra.mxu0 %v71_v1  ;;  %v2497_v8 = vld [vmem:[%s3427_s22] sm:$0xff] }
  0x10   :  { %90 = vmatpush.msra.mxu0 %v70_v2 }
  0x12   :  { %91 = vmatpush.msra.mxu0 %v69_v3 }
  0x14   :  { %92 = vmatpush.msra.mxu0 %v68_v4 }
  0x16   :  { %93 = vmatpush.msra.mxu0 %v67_v5 }
  0x18   :  { %94 = vmatpush.msra.mxu0 %v66_v6 }
  0x19   :  { %24 = vsyncpa [#allocation3], 0  ;;  %v2504_v9 = vld [vmem:[%s3427_s22 + $0x8] sm:$0xff]  ;;  %s3428_s25 = sld [smem:[#allocation8_spill]]  ;;  %v2516_v13 = vld [vmem:[%s3403_s4] ss:$0 sm:$0xff]  ;;  %v126_v23 = vlaneseq }
  0x1a   :  { %95 = vmatpush.msra.mxu0 %v65_v7  ;;  %vm117_vm1 = vcmask 261120   ;;  %vm130_vm2 = vcmask 1041409   ;;  %vm133_vm3 = vcmask 58368   ;;  %v2367_v30 = vmov 0   ;;  %v2539_v52 = vld [vmem:[%s3406_s7 + $0x38] sm:$0xff]  ;;  %v2551_v54 = vld [vmem:[%s3406_s7 + $0x30] sm:$0xff] }
  0x1b   :  { %2210 = vmatmul.msk.f32.vlgmr.msra.gmra.mxu0 %vm73_vm0, %v2497_v8  ;;  %v2526_v24 = vand.u32 127, %v126_v23  ;;  %2270 = vset.pattern.permute.xlu2 %v2367_v30  ;;  %v2544_v53 = vld [vmem:[%s3411_s12 + $0x38] sm:$0xff]  ;;  %v2556_v55 = vld [vmem:[%s3411_s12 + $0x30] sm:$0xff]  ;;  %v2564_v56 = vld [vmem:[%s3406_s7 + $0x28] sm:$0xff]  ;;  %vm269_vm4 = vcmask 130048   ;;  %s3429_s1 = sld [smem:[#allocation6_spill]] }
  0x1c   :  { %2269 = vset.pattern.permute.xlu1 %v2367_v30  ;;  %2271 = vset.pattern.permute.xlu0 %v2367_v30  ;;  %v2569_v57 = vld [vmem:[%s3411_s12 + $0x28] sm:$0xff]  ;;  %v2577_v58 = vld [vmem:[%s3406_s7 + $0x20] sm:$0xff]  ;;  %v2590_v60 = vld [vmem:[%s3406_s7 + $0x18] sm:$0xff]  ;;  %vm324_vm5 = vcmask 517120   ;;  %s2368_s26 = smov 64   ;;  %vm700_vm6 = vcmask 1041920  }
  0x1d   :  { %222 = vmatpush.msra.mxu1 %v2539_v52  ;;  %255 = vmatpush.msra.mxu2 %v2544_v53  ;;  %v2582_v59 = vld [vmem:[%s3411_s12 + $0x20] sm:$0xff]  ;;  %v2595_v61 = vld [vmem:[%s3411_s12 + $0x18] sm:$0xff]  ;;  %v2603_v62 = vld [vmem:[%s3406_s7 + $0x10] sm:$0xff] }
  0x1e   :  { %517 = vmatpush.msrb.mxu0 %v2539_v52  ;;  %v2608_v63 = vld [vmem:[%s3411_s12 + $0x10] sm:$0xff]  ;;  %v2613_v0 = vld [vmem:[%s3406_s7 + $0x8] sm:$0xff]  ;;  %v2626_v2 = vld [vmem:[%s3406_s7] sm:$0xff] }
  0x1f   :  { %v2272_v10 = vld [vmem:[%s3428_s25] ss:$0 sm:$0xff]  ;;  %223 = vmatpush.msra.mxu1 %v2551_v54  ;;  %256 = vmatpush.msra.mxu2 %v2556_v55  ;;  %v2621_v1 = vld [vmem:[%s3411_s12 + $0x8] sm:$0xff] }
  0x20   :  { %518 = vmatpush.msrb.mxu0 %v2551_v54  ;;  %v2631_v3 = vld [vmem:[%s3411_s12] sm:$0xff] }
  0x21   :  { %224 = vmatpush.msra.mxu1 %v2564_v56  ;;  %257 = vmatpush.msra.mxu2 %v2569_v57  ;;  %v2656_v30 = vld [vmem:[%s3412_s13] sm:$0xff] }
  0x22   :  { %519 = vmatpush.msrb.mxu0 %v2564_v56 }
  0x23   :  { %2211 = vmatmul.msk.f32.gmra.mxu0 %vm73_vm0, %v2504_v9  ;;  %225 = vmatpush.msra.mxu1 %v2577_v58 }
  0x24   :  { %258 = vmatpush.msra.mxu2 %v2582_v59  ;;  %520 = vmatpush.msrb.mxu0 %v2577_v58 }
  0x25   :  { %226 = vmatpush.msra.mxu1 %v2590_v60 }
  0x26   :  { %259 = vmatpush.msra.mxu2 %v2595_v61  ;;  %521 = vmatpush.msrb.mxu0 %v2590_v60 }
  0x27   :  { %227 = vmatpush.msra.mxu1 %v2603_v62 }
  0x28   :  { %260 = vmatpush.msra.mxu2 %v2608_v63  ;;  %522 = vmatpush.msrb.mxu0 %v2603_v62 }
  0x29   :  { %228 = vmatpush.msra.mxu1 %v2613_v0 }
  0x2a   :  { %261 = vmatpush.msra.mxu2 %v2621_v1  ;;  %523 = vmatpush.msrb.mxu0 %v2613_v0 }
  0x2b   :  { %229 = vmatpush.msra.mxu1 %v2626_v2 }
  0x2c   :  { %262 = vmatpush.msra.mxu2 %v2631_v3  ;;  %524 = vmatpush.msrb.mxu0 %v2626_v2 }
  0x98   :  { %v97_v11 = vpop.f32.mrf.mxu0 }
  0x99   :  { %v2511_v12 = vadd.f32 %v2272_v10, %v97_v11 }
  0x9b   :  { %v110_v14 = vmax.f32 %v2511_v12, 0.0 }
  0x9d   :  { %v115_v15 = vmul.f32 %v2516_v13, %v110_v14 }
  0x9f   :  { %v118_v16 = vsel %vm117_vm1, %v115_v15, 0.0 }
  0xa0   :  { %119 = vadd.xlane.f32.xlu0 %v118_v16  ;;  %v100_v17 = vpop.f32.mrf.mxu0 }
  0xa1   :  { %v2521_v18 = vadd.f32 %v2272_v10, %v100_v17 }
  0xa3   :  { %v111_v19 = vmax.f32 %v2521_v18, 0.0 }
  0xa5   :  { %v116_v20 = vmul.f32 %v2516_v13, %v111_v19 }
  0xa7   :  { %v121_v21 = vsel %vm117_vm1, %v116_v20, 0.0 }
  0xa8   :  { %122 = vadd.xlane.f32.xlu0 %v121_v21 }
 0x113   :  { %v120_v22 = vpop.xlane.xlu0 %119 }
 0x114   :  { %v128_v26 = vperm.slane %v120_v22, %v2526_v24 }
 0x11b   :  { %v123_v25 = vpop.xlane.xlu0 %122 }
 0x11c   :  { %v129_v27 = vperm.slane %v123_v25, %v2526_v24 }
 0x11e   :  { %v131_v28 = vsel %vm130_vm2, %v129_v27, %v128_v26 }
 0x11f   :  { %v134_v29 = vsel %vm133_vm3, %v131_v28, -inf }
 0x120   :  { %135 = vmax.xlane.f32.xlu1 %v134_v29  ;;  %v2650_v29 = vld [vmem:[%s3412_s13 + $0x8] sm:$0xff] }
 0x121   :  { %287 = vmatpush.msra.mxu3 %v2650_v29 }
 0x123   :  { %288 = vmatpush.msra.mxu3 %v2656_v30 }
 0x193   :  { %v136_v31 = vpop.xlane.xlu1 %135 }
 0x194   :  { %v138_v32 = vperm.slane %v136_v31, 0  ;;  %v139_v33 = vperm.slane %v136_v31, 1  ;;  %v2662_v31 = vld [vmem:[%s3416_s17 + $0x8] sm:$0xff] }
 0x195   :  { %318 = vmatpush.msrb.mxu3 %v2662_v31 }
 0x196   :  { %v142_v34 = vsub.f32 %v120_v22, %v138_v32  ;;  %v143_v35 = vsub.f32 %v123_v25, %v139_v33  ;;  %v2274_v32 = vld [vmem:[%s3407_s8] ss:$0 sm:$0xff] }
 0x198   :  { %v144_v36 = vmul.f32 1.442695, %v142_v34  ;;  %v146_v37 = vmul.f32 1.442695, %v143_v35 }
 0x19a   :  { %2302 = vpow2.f32 %v144_v36  ;;  %v2672_v36 = vld [vmem:[%s3414_s15 + $0x8] sm:$0xff] }
 0x19b   :  { %2304 = vpow2.f32 %v146_v37  ;;  %v2677_v37 = vld [vmem:[%s3416_s17] sm:$0xff]  ;;  %372 = vmatpush.msrb.mxu1 %v2672_v36 }
 0x19c   :  { %319 = vmatpush.msrb.mxu3 %v2677_v37 }
 0x1a0   :  { %v2303_v38 = vpop.eup %2302 }
 0x1a1   :  { %v2305_v39 = vpop.eup %2304  ;;  %151 = vperm.xlu1 %2269, %v2303_v38  }
 0x1a2   :  { %154 = vperm.xlu2 %2270, %v2305_v39  }
 0x1fc   :  { %v155_v40 = vpop.permute.xlu2 %154 }
 0x1fd   :  { %v157_v42 = vperm.slane %v155_v40, %v2526_v24  ;;  %v2695_v40 = vld [vmem:[%s3408_s9] sm:$0xff] }
 0x213   :  { %v152_v41 = vpop.permute.xlu1 %151 }
 0x214   :  { %v156_v43 = vperm.slane %v152_v41, %v2526_v24  ;;  %v2702_v41 = vld [vmem:[%s3405_s6 + $0x18] sm:$0xff] }
 0x216   :  { %v158_v44 = vsel %vm130_vm2, %v157_v42, %v156_v43  ;;  %v2707_v42 = vld [vmem:[%s3405_s6 + $0x10] sm:$0xff]  ;;  %v2275_v43 = vld [vmem:[%s3413_s14] ss:$0 sm:$0xff] }
 0x217   :  { %v160_v45 = vsel %vm133_vm3, %v158_v44, 0.0 }
 0x218   :  { %161 = vadd.xlane.f32.xlu2 %v160_v45 }
 0x28b   :  { %v162_v46 = vpop.xlane.xlu2 %161 }
 0x28c   :  { %2306 = vrcp.f32 %v162_v46 }
 0x292   :  { %v2307_v47 = vpop.eup %2306 }
 0x293   :  { %v166_v48 = vperm.slane %v2307_v47, 1  ;;  %v165_v49 = vperm.slane %v2307_v47, 0 }
 0x295   :  { %v170_v50 = vmul.f32 %v2305_v39, %v166_v48  ;;  %v169_v51 = vmul.f32 %v2303_v38, %v165_v49  ;;  %v2683_v38 = vld [vmem:[%s3414_s15] sm:$0xff]  ;;  %v2690_v39 = vld [vmem:[%s3408_s9 + $0x8] sm:$0xff] }
 0x296   :  { %373 = vmatpush.msrb.mxu1 %v2683_v38  ;;  %v2720_v49 = vld [vmem:[%s3405_s6 + $0x8] sm:$0xff] }
 0x297   :  { %178 = vperm.xlu1 %2269, %v170_v50   ;;  %173 = vperm.xlu0 %2271, %v169_v51   ;;  %v2726_v50 = vld [vmem:[%s3405_s6] sm:$0xff]  ;;  %v2734_v51 = vld [vmem:[%s3429_s1 + $0x18] sm:$0xff] }
 0x298   :  { %397 = vmatpush.msrb.mxu2 %v2734_v51 }
 0x309   :  { %v179_v4 = vpop.permute.xlu1 %178  ;;  %v174_v5 = vpop.permute.xlu0 %173 }
 0x30a   :  { %v182_v6 = vmul.f32 %v179_v4, %v2504_v9  ;;  %v181_v7 = vmul.f32 %v174_v5, %v2497_v8  ;;  %v2739_v4 = vld [vmem:[%s3404_s5 + $0x18] sm:$0xff]  ;;  %v2744_v5 = vld [vmem:[%s3429_s1 + $0x10] sm:$0xff] }
 0x30b   :  { %398 = vmatpush.msrb.mxu2 %v2744_v5 }
 0x30c   :  { %v190_v10 = vsel %vm73_vm0, %v182_v6, 0.0  ;;  %v183_v11 = vsel %vm73_vm0, %v181_v7, 0.0  ;;  %v2751_v6 = vld [vmem:[%s3404_s5 + $0x10] sm:$0xff]  ;;  %v2756_v7 = vld [vmem:[%s3429_s1 + $0x8] sm:$0xff] }
 0x30d   :  { %v191_v14 = vrot.slane %v190_v10, 4  ;;  %v184_v15 = vrot.slane %v183_v11, 4  ;;  %399 = vmatpush.msrb.mxu2 %v2756_v7 }
 0x30f   :  { %v192_v16 = vadd.f32 %v191_v14, %v190_v10  ;;  %v185_v17 = vadd.f32 %v184_v15, %v183_v11  ;;  %v2764_v10 = vld [vmem:[%s3404_s5 + $0x8] sm:$0xff]  ;;  %v2770_v11 = vld [vmem:[%s3429_s1] sm:$0xff] }
 0x310   :  { %v2775_v14 = vld [vmem:[%s3404_s5] sm:$0xff]  ;;  %400 = vmatpush.msrb.mxu2 %v2770_v11 }
 0x311   :  { %v193_v19 = vrot.slane %v192_v16, 2  ;;  %v186_v20 = vrot.slane %v185_v17, 2  ;;  %v2276_v15 = vld [vmem:[%s3415_s16] ss:$0 sm:$0xff] }
 0x313   :  { %v194_v21 = vadd.f32 %v193_v19, %v192_v16  ;;  %v187_v22 = vadd.f32 %v186_v20, %v185_v17  ;;  %v2277_v19 = vld [vmem:[%s3417_s18] ss:$0 sm:$0xff] }
 0x315   :  { %v195_v23 = vrot.slane %v194_v21, 1  ;;  %v188_v25 = vrot.slane %v187_v22, 1 }
 0x317   :  { %v189_v26 = vadd.f32 %v188_v25, %v187_v22  ;;  %v196_v27 = vadd.f32 %v195_v23, %v194_v21  ;;  %v2278_v22 = vld [vmem:[%s3409_s10] ss:$0 sm:$0xff] }
 0x319   :  { %v211_v28 = vsel %vm130_vm2, %v196_v27, %v189_v26 }
 0x31a   :  { %2212 = vmatmul.msk.f32.vlgmr.msra.gmra.mxu1 %vm73_vm0, %v211_v28  ;;  %2213 = vmatmul.msk.f32.vlgmr.msra.gmra.mxu2 %vm73_vm0, %v211_v28 }
 0x31b   :  { %573 = vmatpush.msra.mxu1 %v2702_v41  ;;  %603 = vmatpush.msra.mxu2 %v2544_v53 }
 0x31d   :  { %574 = vmatpush.msra.mxu1 %v2707_v42  ;;  %604 = vmatpush.msra.mxu2 %v2556_v55 }
 0x31f   :  { %575 = vmatpush.msra.mxu1 %v2720_v49  ;;  %605 = vmatpush.msra.mxu2 %v2569_v57 }
 0x321   :  { %576 = vmatpush.msra.mxu1 %v2726_v50  ;;  %606 = vmatpush.msra.mxu2 %v2582_v59 }
 0x323   :  { %607 = vmatpush.msra.mxu2 %v2595_v61 }
 0x325   :  { %608 = vmatpush.msra.mxu2 %v2608_v63 }
 0x327   :  { %609 = vmatpush.msra.mxu2 %v2621_v1 }
 0x329   :  { %610 = vmatpush.msra.mxu2 %v2631_v3 }
 0x397   :  { %v231_v33 = vpop.f32.mrf.mxu1 }
 0x398   :  { %v232_v34 = vadd.f32 %v2274_v32, %v231_v33 }
 0x39a   :  { %v234_v35 = vmax.f32 %v232_v34, 0.0 }
 0x39c   :  { %2214 = vmatmul.msk.f32.vlgmr.msra.gmra.mxu3 %vm269_vm4, %v234_v35 }
 0x39d   :  { %346 = vmatpush.msra.mxu3 %v2690_v39  ;;  %v264_v44 = vpop.f32.mrf.mxu2 }
 0x39e   :  { %v265_v45 = vadd.f32 %v2275_v43, %v264_v44 }
 0x39f   :  { %347 = vmatpush.msra.mxu3 %v2695_v40 }
 0x41f   :  { %v290_v46 = vpop.f32.mrf.mxu3 }
 0x420   :  { %v293_v47 = vadd.f32 %v290_v46, %v265_v45 }
 0x422   :  { %v294_v48 = vmax.f32 %v293_v47, 0.0 }
 0x424   :  { %2215 = vmatmul.msk.f32.vlgmr.msrb.gmra.mxu3 %vm269_vm4, %v294_v48  ;;  %2217 = vmatmul.msk.f32.vlgmr.msrb.gmra.mxu1 %vm269_vm4, %v294_v48 }
 0x425   :  { %690 = vmatpush.msrb.mxu1 %v2662_v31  ;;  %545 = vmatpush.msrb.mxu3 %v2739_v4 }
 0x427   :  { %691 = vmatpush.msrb.mxu1 %v2677_v37  ;;  %546 = vmatpush.msrb.mxu3 %v2751_v6 }
 0x429   :  { %547 = vmatpush.msrb.mxu3 %v2764_v10 }
 0x42b   :  { %548 = vmatpush.msrb.mxu3 %v2775_v14 }
 0x42c   :  { %2216 = vmatmul.msk.f32.vlgmr.msra.gmra.mxu3 %vm269_vm4, %v234_v35 }
 0x42d   :  { %634 = vmatpush.msra.mxu3 %v2650_v29 }
 0x42f   :  { %635 = vmatpush.msra.mxu3 %v2656_v30 }
 0x4a1   :  { %v375_v16 = vpop.f32.mrf.mxu1 }
 0x4a2   :  { %v2792_v17 = vadd.f32 %v2276_v15, %v375_v16 }
 0x4a4   :  { %2221 = vmatmul.msk.f32.vlgmr.msra.gmra.mxu1 %vm117_vm1, %v2792_v17 }
 0x4a5   :  { %773 = vmatpush.msra.mxu1 %v2734_v51 }
 0x4a7   :  { %v321_v20 = vpop.f32.mrf.mxu3  ;;  %774 = vmatpush.msra.mxu1 %v2744_v5 }
 0x4a8   :  { %v322_v21 = vadd.f32 %v2277_v19, %v321_v20 }
 0x4a9   :  { %775 = vmatpush.msra.mxu1 %v2756_v7 }
 0x4aa   :  { %325 = vst.msk [vmem:[#allocation2] sm:$0x3] %vm324_vm5, %v322_v21 }
 0x4ab   :  { %776 = vmatpush.msra.mxu1 %v2770_v11 }
 0x4af   :  { %v349_v23 = vpop.f32.mrf.mxu3 }
 0x4b0   :  { %v350_v25 = vadd.f32 %v2278_v22, %v349_v23 }
 0x4b2   :  { %2218 = vmatmul.msk.f32.vlgmr.msrb.gmra.mxu2 %vm117_vm1, %v350_v25  ;;  %2220 = vmatmul.msk.f32.vlgmr.msrb.gmra.mxu3 %vm117_vm1, %v350_v25 }
 0x4b3   :  { %722 = vmatpush.msrb.mxu3 %v2690_v39  ;;  %893 = vmatpush.msrb.mxu2 %v2539_v52 }
 0x4b5   :  { %723 = vmatpush.msrb.mxu3 %v2695_v40  ;;  %894 = vmatpush.msrb.mxu2 %v2551_v54 }
 0x4b7   :  { %895 = vmatpush.msrb.mxu2 %v2564_v56 }
 0x4b9   :  { %896 = vmatpush.msrb.mxu2 %v2577_v58 }
 0x4bb   :  { %897 = vmatpush.msrb.mxu2 %v2590_v60 }
 0x4bd   :  { %898 = vmatpush.msrb.mxu2 %v2603_v62 }
 0x4bf   :  { %899 = vmatpush.msrb.mxu2 %v2613_v0 }
 0x4c1   :  { %900 = vmatpush.msrb.mxu2 %v2626_v2 }
 0x535   :  { %v402_v26 = vpop.f32.mrf.mxu2 }
 0x536   :  { %v406_v27 = vrot.slane %v402_v26, 1  ;;  %v407_v28 = vperm.slane %v402_v26, 0 }
 0x538   :  { %v408_v52 = vperm.slane %v406_v27, 0  ;;  %v411_v32 = vadd.f32 %v407_v28, %v2511_v12 }
 0x53a   :  { %v412_v54 = vadd.f32 %v408_v52, %v2521_v18  ;;  %v413_v33 = vmax.f32 %v411_v32, 0.0 }
 0x53c   :  { %v415_v56 = vmul.f32 %v2516_v13, %v413_v33  ;;  %v414_v58 = vmax.f32 %v412_v54, 0.0 }
 0x53e   :  { %v417_v60 = vsel %vm117_vm1, %v415_v56, 0.0  ;;  %v416_v62 = vmul.f32 %v2516_v13, %v414_v58 }
 0x53f   :  { %418 = vadd.xlane.f32.xlu1 %v417_v60 }
 0x540   :  { %v420_v0 = vsel %vm117_vm1, %v416_v62, 0.0 }
 0x541   :  { %421 = vadd.xlane.f32.xlu2 %v420_v0  ;;  %v2836_v0 = vld [vmem:[%s3410_s11 + $0x18] sm:$0xff] }
 0x542   :  { %657 = vmatpush.msra.mxu0 %v2836_v0 }
 0x5b2   :  { %v419_v2 = vpop.xlane.xlu1 %418 }
 0x5b3   :  { %v425_v35 = vperm.slane %v419_v2, %v2526_v24 }
 0x5b4   :  { %v422_v34 = vpop.xlane.xlu2 %421 }
 0x5b5   :  { %v426_v43 = vperm.slane %v422_v34, %v2526_v24 }
 0x5b7   :  { %v427_v44 = vsel %vm130_vm2, %v426_v43, %v425_v35  ;;  %v2848_v35 = vld [vmem:[%s3410_s11 + $0x8] sm:$0xff]  ;;  %v2854_v43 = vld [vmem:[%s3410_s11] sm:$0xff] }
 0x5b8   :  { %v429_v45 = vsel %vm133_vm3, %v427_v44, -inf }
 0x5b9   :  { %430 = vmax.xlane.f32.xlu0 %v429_v45 }
 0x62c   :  { %v431_v46 = vpop.xlane.xlu0 %430 }
 0x62d   :  { %v433_v47 = vperm.slane %v431_v46, 0  ;;  %v434_v48 = vperm.slane %v431_v46, 1 }
 0x62f   :  { %v437_v15 = vsub.f32 %v419_v2, %v433_v47  ;;  %v438_v19 = vsub.f32 %v422_v34, %v434_v48  ;;  %v2841_v2 = vld [vmem:[%s3410_s11 + $0x10] sm:$0xff] }
 0x630   :  { %658 = vmatpush.msra.mxu0 %v2841_v2 }
 0x631   :  { %v439_v16 = vmul.f32 1.442695, %v437_v15  ;;  %v441_v20 = vmul.f32 1.442695, %v438_v19 }
 0x632   :  { %659 = vmatpush.msra.mxu0 %v2848_v35 }
 0x633   :  { %2308 = vpow2.f32 %v439_v16 }
 0x634   :  { %2310 = vpow2.f32 %v441_v20  ;;  %660 = vmatpush.msra.mxu0 %v2854_v43 }
 0x639   :  { %v2309_v21 = vpop.eup %2308 }
 0x63a   :  { %446 = vperm.xlu2 %2270, %v2309_v21   ;;  %v2311_v22 = vpop.eup %2310 }
 0x642   :  { %449 = vperm.xlu2 %2270, %v2311_v22  }
 0x694   :  { %v447_v23 = vpop.permute.xlu2 %446 }
 0x695   :  { %v451_v26 = vperm.slane %v447_v23, %v2526_v24 }
 0x69c   :  { %v450_v25 = vpop.permute.xlu2 %449 }
 0x69d   :  { %v452_v27 = vperm.slane %v450_v25, %v2526_v24 }
 0x69f   :  { %v453_v28 = vsel %vm130_vm2, %v452_v27, %v451_v26 }
 0x6a0   :  { %v455_v52 = vsel %vm133_vm3, %v453_v28, 0.0 }
 0x6a1   :  { %456 = vadd.xlane.f32.xlu1 %v455_v52 }
 0x714   :  { %v457_v32 = vpop.xlane.xlu1 %456 }
 0x715   :  { %2312 = vrcp.f32 %v457_v32  ;;  %v2279_v32 = vld [vmem:[%s3407_s8] ss:$0 sm:$0xff] }
 0x71b   :  { %v2313_v54 = vpop.eup %2312 }
 0x71c   :  { %v461_v33 = vperm.slane %v2313_v54, 1  ;;  %v460_v56 = vperm.slane %v2313_v54, 0 }
 0x71e   :  { %v465_v58 = vmul.f32 %v2311_v22, %v461_v33  ;;  %v464_v60 = vmul.f32 %v2309_v21, %v460_v56  ;;  %v550_v33 = vpop.f32.mrf.mxu3 }
 0x720   :  { %473 = vperm.xlu1 %2269, %v465_v58   ;;  %468 = vperm.xlu2 %2270, %v464_v60  }
 0x77a   :  { %v469_v62 = vpop.permute.xlu2 %468 }
 0x77b   :  { %v476_v34 = vmul.f32 %v469_v62, %v2497_v8 }
 0x77d   :  { %v478_v44 = vsel %vm73_vm0, %v476_v34, 0.0 }
 0x77e   :  { %v479_v45 = vrot.slane %v478_v44, 4 }
 0x780   :  { %v480_v46 = vadd.f32 %v479_v45, %v478_v44 }
 0x782   :  { %v481_v15 = vrot.slane %v480_v46, 2 }
 0x784   :  { %v482_v20 = vadd.f32 %v481_v15, %v480_v46  ;;  %v2281_v15 = vld [vmem:[%s3409_s10] ss:$0 sm:$0xff] }
 0x786   :  { %v483_v23 = vrot.slane %v482_v20, 1 }
 0x788   :  { %v484_v27 = vadd.f32 %v483_v23, %v482_v20 }
 0x792   :  { %v474_v47 = vpop.permute.xlu1 %473 }
 0x793   :  { %v477_v48 = vmul.f32 %v474_v47, %v2504_v9 }
 0x795   :  { %v485_v16 = vsel %vm73_vm0, %v477_v48, 0.0 }
 0x796   :  { %v486_v19 = vrot.slane %v485_v16, 4 }
 0x798   :  { %v487_v21 = vadd.f32 %v486_v19, %v485_v16 }
 0x79a   :  { %v488_v22 = vrot.slane %v487_v21, 2 }
 0x79c   :  { %v489_v25 = vadd.f32 %v488_v22, %v487_v21 }
 0x79e   :  { %v490_v26 = vrot.slane %v489_v25, 1 }
 0x7a0   :  { %v491_v28 = vadd.f32 %v490_v26, %v489_v25 }
 0x7a2   :  { %v506_v52 = vsel %vm130_vm2, %v491_v28, %v484_v27 }
 0x7a3   :  { %2219 = vmatmul.msk.f32.vlgmr.msrb.gmra.mxu0 %vm73_vm0, %v506_v52  ;;  %2222 = vmatmul.msk.f32.vlgmr.msra.gmra.mxu2 %vm73_vm0, %v506_v52 }
 0x7a4   :  { %748 = vmatpush.msrb.mxu0 %v2672_v36  ;;  %1066 = vmatpush.msra.mxu2 %v2662_v31 }
 0x7a6   :  { %749 = vmatpush.msrb.mxu0 %v2683_v38  ;;  %1067 = vmatpush.msra.mxu2 %v2677_v37  ;;  %v578_v37 = vpop.f32.mrf.mxu1 }
 0x7ab   :  { %2224 = vmatmul.msk.f32.vlgmr.msra.gmra.mxu0 %vm117_vm1, %v2792_v17  ;;  %v2280_v17 = vld [vmem:[%s3413_s14] ss:$0 sm:$0xff] }
 0x7ac   :  { %949 = vmatpush.msra.mxu0 %v2702_v41 }
 0x7ae   :  { %950 = vmatpush.msra.mxu0 %v2707_v42 }
 0x7b0   :  { %951 = vmatpush.msra.mxu0 %v2720_v49 }
 0x7b2   :  { %952 = vmatpush.msra.mxu0 %v2726_v50 }
 0x820   :  { %v526_v31 = vpop.f32.mrf.mxu0 }
 0x821   :  { %v527_v54 = vadd.f32 %v2279_v32, %v526_v31 }
 0x823   :  { %v553_v56 = vadd.f32 %v550_v33, %v527_v54 }
 0x825   :  { %v581_v58 = vadd.f32 %v578_v37, %v553_v56 }
 0x826   :  { %v612_v62 = vpop.f32.mrf.mxu2 }
 0x827   :  { %v582_v60 = vmax.f32 %v581_v58, 0.0  ;;  %v613_v34 = vadd.f32 %v2280_v17, %v612_v62 }
 0x828   :  { %v662_v46 = vpop.f32.mrf.mxu0 }
 0x829   :  { %2223 = vmatmul.msk.f32.vlgmr.msra.gmra.mxu3 %vm269_vm4, %v582_v60 }
 0x82a   :  { %921 = vmatpush.msra.mxu3 %v2739_v4 }
 0x82c   :  { %922 = vmatpush.msra.mxu3 %v2751_v6 }
 0x82e   :  { %923 = vmatpush.msra.mxu3 %v2764_v10 }
 0x830   :  { %924 = vmatpush.msra.mxu3 %v2775_v14 }
 0x831   :  { %2226 = vmatmul.msk.f32.vlgmr.msrb.gmra.mxu3 %vm269_vm4, %v582_v60 }
 0x832   :  { %1010 = vmatpush.msrb.mxu3 %v2650_v29 }
 0x834   :  { %1011 = vmatpush.msrb.mxu3 %v2656_v30 }
 0x8ac   :  { %v637_v44 = vpop.f32.mrf.mxu3 }
 0x8ad   :  { %v640_v45 = vadd.f32 %v637_v44, %v613_v34 }
 0x8af   :  { %v665_v47 = vadd.f32 %v662_v46, %v640_v45 }
 0x8b1   :  { %v666_v48 = vmax.f32 %v665_v47, 0.0 }
 0x8b3   :  { %2225 = vmatmul.msk.f32.vlgmr.msrb.gmra.mxu1 %vm269_vm4, %v666_v48  ;;  %2227 = vmatmul.msk.f32.vlgmr.msrb.gmra.mxu0 %vm269_vm4, %v666_v48 }
 0x8b4   :  { %v725_v29 = vpop.f32.mrf.mxu3  ;;  %1033 = vmatpush.msrb.mxu0 %v2836_v0  ;;  %979 = vmatpush.msrb.mxu1 %v2544_v53  ;;  %v2283_v53 = vld [vmem:[%s3415_s16] ss:$0 sm:$0xff] }
 0x8b5   :  { %v726_v30 = vadd.f32 %v2281_v15, %v725_v29 }
 0x8b6   :  { %1034 = vmatpush.msrb.mxu0 %v2841_v2  ;;  %980 = vmatpush.msrb.mxu1 %v2556_v55 }
 0x8b7   :  { %2230 = vmatmul.msk.f32.vlgmr.msra.gmra.mxu3 %vm117_vm1, %v726_v30 }
 0x8b8   :  { %1035 = vmatpush.msrb.mxu0 %v2848_v35  ;;  %981 = vmatpush.msrb.mxu1 %v2569_v57 }
 0x8b9   :  { %1093 = vmatpush.msra.mxu3 %v2690_v39 }
 0x8ba   :  { %1036 = vmatpush.msrb.mxu0 %v2854_v43  ;;  %982 = vmatpush.msrb.mxu1 %v2582_v59 }
 0x8bb   :  { %2228 = vmatmul.msk.f32.vlgmr.msra.gmra.mxu1 %vm117_vm1, %v726_v30  ;;  %1094 = vmatpush.msra.mxu3 %v2695_v40 }
 0x8bc   :  { %983 = vmatpush.msrb.mxu1 %v2595_v61 }
 0x8be   :  { %984 = vmatpush.msrb.mxu1 %v2608_v63 }
 0x8c0   :  { %985 = vmatpush.msrb.mxu1 %v2621_v1 }
 0x8c2   :  { %986 = vmatpush.msrb.mxu1 %v2631_v3 }
 0x8c4   :  { %1144 = vmatpush.msra.mxu1 %v2734_v51 }
 0x8c6   :  { %1145 = vmatpush.msra.mxu1 %v2744_v5 }
 0x8c8   :  { %1146 = vmatpush.msra.mxu1 %v2756_v7 }
 0x8ca   :  { %1147 = vmatpush.msra.mxu1 %v2770_v11 }
 0x930   :  { %v2916_v55 = vpop.f32.mrf.mxu1  ;;  %v751_v57 = vpop.f32.mrf.mxu0 }
 0x931   :  { %v752_v59 = vadd.f32 %v2283_v53, %v751_v57 }
 0x933   :  { %2231 = vmatmul.msk.f32.vlgmr.msra.gmra.mxu0 %vm117_vm1, %v752_v59 }
 0x934   :  { %1119 = vmatpush.msra.mxu0 %v2672_v36 }
 0x936   :  { %1120 = vmatpush.msra.mxu0 %v2683_v38 }
 0x938   :  { %v778_v61 = vpop.f32.mrf.mxu1 }
 0x939   :  { %v782_v63 = vrot.slane %v778_v61, 1  ;;  %v783_v1 = vperm.slane %v778_v61, 0 }
 0x93b   :  { %v784_v3 = vperm.slane %v782_v63, 0  ;;  %v787_v39 = vadd.f32 %v783_v1, %v2511_v12  ;;  %2234 = vmatmul.msk.f32.vlgmr.msrb.gmra.mxu0 %vm117_vm1, %v752_v59 }
 0x93c   :  { %1320 = vmatpush.msrb.mxu0 %v2702_v41 }
 0x93d   :  { %v788_v40 = vadd.f32 %v784_v3, %v2521_v18  ;;  %v789_v51 = vmax.f32 %v787_v39, 0.0 }
 0x93e   :  { %1321 = vmatpush.msrb.mxu0 %v2707_v42 }
 0x93f   :  { %v791_v5 = vmul.f32 %v2516_v13, %v789_v51  ;;  %v790_v36 = vmax.f32 %v788_v40, 0.0 }
 0x940   :  { %1322 = vmatpush.msrb.mxu0 %v2720_v49 }
 0x941   :  { %v793_v38 = vsel %vm117_vm1, %v791_v5, 0.0  ;;  %v792_v7 = vmul.f32 %v2516_v13, %v790_v36 }
 0x942   :  { %794 = vadd.xlane.f32.xlu2 %v793_v38  ;;  %1323 = vmatpush.msrb.mxu0 %v2726_v50 }
 0x943   :  { %v796_v11 = vsel %vm117_vm1, %v792_v7, 0.0  ;;  %v926_v7 = vpop.f32.mrf.mxu3 }
 0x944   :  { %797 = vadd.xlane.f32.xlu0 %v796_v11 }
 0x9b5   :  { %v795_v41 = vpop.xlane.xlu2 %794 }
 0x9b6   :  { %v801_v19 = vperm.slane %v795_v41, %v2526_v24 }
 0x9b7   :  { %v798_v16 = vpop.xlane.xlu0 %797 }
 0x9b8   :  { %v802_v42 = vperm.slane %v798_v16, %v2526_v24 }
 0x9ba   :  { %v803_v20 = vsel %vm130_vm2, %v802_v42, %v801_v19  ;;  %v2284_v42 = vld [vmem:[%s3413_s14] ss:$0 sm:$0xff] }
 0x9bb   :  { %v805_v49 = vsel %vm133_vm3, %v803_v20, -inf }
 0x9bc   :  { %806 = vmax.xlane.f32.xlu0 %v805_v49 }
 0xa2f   :  { %v807_v21 = vpop.xlane.xlu0 %806 }
 0xa30   :  { %v809_v22 = vperm.slane %v807_v21, 0  ;;  %v810_v23 = vperm.slane %v807_v21, 1 }
 0xa32   :  { %v813_v25 = vsub.f32 %v795_v41, %v809_v22  ;;  %v814_v26 = vsub.f32 %v798_v16, %v810_v23  ;;  %v954_v41 = vpop.f32.mrf.mxu0 }
 0xa34   :  { %v815_v50 = vmul.f32 1.442695, %v813_v25  ;;  %v817_v27 = vmul.f32 1.442695, %v814_v26 }
 0xa36   :  { %2314 = vpow2.f32 %v815_v50 }
 0xa37   :  { %2316 = vpow2.f32 %v817_v27 }
 0xa3a   :  { %v1038_v23 = vpop.f32.mrf.mxu0 }
 0xa3c   :  { %v2315_v28 = vpop.eup %2314 }
 0xa3d   :  { %v2317_v52 = vpop.eup %2316  ;;  %822 = vperm.xlu0 %2271, %v2315_v28  }
 0xa3e   :  { %825 = vperm.xlu1 %2269, %v2317_v52  }
 0xaaf   :  { %v823_v32 = vpop.permute.xlu0 %822 }
 0xab0   :  { %v826_v31 = vpop.permute.xlu1 %825  ;;  %v827_v54 = vperm.slane %v823_v32, %v2526_v24 }
 0xab1   :  { %v828_v33 = vperm.slane %v826_v31, %v2526_v24 }
 0xab3   :  { %v829_v56 = vsel %vm130_vm2, %v828_v33, %v827_v54 }
 0xab4   :  { %v831_v37 = vsel %vm133_vm3, %v829_v56, 0.0 }
 0xab5   :  { %832 = vadd.xlane.f32.xlu1 %v831_v37 }
 0xb28   :  { %v833_v58 = vpop.xlane.xlu1 %832 }
 0xb29   :  { %2318 = vrcp.f32 %v833_v58 }
 0xb2f   :  { %v2319_v60 = vpop.eup %2318 }
 0xb30   :  { %v837_v17 = vperm.slane %v2319_v60, 1  ;;  %v836_v62 = vperm.slane %v2319_v60, 0 }
 0xb32   :  { %v841_v34 = vmul.f32 %v2317_v52, %v837_v17  ;;  %v840_v44 = vmul.f32 %v2315_v28, %v836_v62  ;;  %v2288_v28 = vld [vmem:[%s3417_s18] ss:$0 sm:$0xff] }
 0xb34   :  { %849 = vperm.xlu2 %2270, %v841_v34   ;;  %844 = vperm.xlu0 %2271, %v840_v44  }
 0xb8e   :  { %v850_v45 = vpop.permute.xlu2 %849 }
 0xb8f   :  { %v853_v46 = vmul.f32 %v850_v45, %v2504_v9 }
 0xb91   :  { %v861_v47 = vsel %vm73_vm0, %v853_v46, 0.0 }
 0xb92   :  { %v862_v48 = vrot.slane %v861_v47, 4 }
 0xb94   :  { %v863_v15 = vadd.f32 %v862_v48, %v861_v47 }
 0xb96   :  { %v864_v53 = vrot.slane %v863_v15, 2 }
 0xb98   :  { %v865_v61 = vadd.f32 %v864_v53, %v863_v15 }
 0xb9a   :  { %v866_v3 = vrot.slane %v865_v61, 1 }
 0xb9c   :  { %v867_v51 = vadd.f32 %v866_v3, %v865_v61 }
 0xba6   :  { %v845_v29 = vpop.permute.xlu0 %844 }
 0xba7   :  { %v852_v30 = vmul.f32 %v845_v29, %v2497_v8  ;;  %v2285_v8 = vld [vmem:[%s3407_s8] ss:$0 sm:$0xff] }
 0xba9   :  { %v854_v57 = vsel %vm73_vm0, %v852_v30, 0.0 }
 0xbaa   :  { %v855_v59 = vrot.slane %v854_v57, 4 }
 0xbac   :  { %v856_v63 = vadd.f32 %v855_v59, %v854_v57 }
 0xbae   :  { %v857_v1 = vrot.slane %v856_v63, 2 }
 0xbb0   :  { %v858_v39 = vadd.f32 %v857_v1, %v856_v63 }
 0xbb2   :  { %v859_v40 = vrot.slane %v858_v39, 1 }
 0xbb4   :  { %v860_v5 = vadd.f32 %v859_v40, %v858_v39 }
 0xbb6   :  { %v882_v9 = vsel %vm130_vm2, %v867_v51, %v860_v5 }
 0xbb7   :  { %2229 = vmatmul.msk.f32.vlgmr.msrb.gmra.mxu2 %vm73_vm0, %v882_v9  ;;  %2232 = vmatmul.msk.f32.vlgmr.msrb.gmra.mxu1 %vm73_vm0, %v882_v9 }
 0xc34   :  { %v988_v20 = vpop.f32.mrf.mxu1 }
 0xc35   :  { %v989_v49 = vadd.f32 %v2284_v42, %v988_v20  ;;  %v2996_v42 = vld [vmem:[%s3406_s7 + $0x38] sm:$0xff] }
 0xc36   :  { %v3001_v20 = vld [vmem:[%s3411_s12 + $0x38] sm:$0xff]  ;;  %1264 = vmatpush.msrb.mxu2 %v2996_v42 }
 0xc37   :  { %1350 = vmatpush.msrb.mxu1 %v3001_v20 }
 0xc3a   :  { %v902_v36 = vpop.f32.mrf.mxu2 }
 0xc3b   :  { %v903_v38 = vadd.f32 %v2285_v8, %v902_v36 }
 0xc3d   :  { %v929_v11 = vadd.f32 %v926_v7, %v903_v38 }
 0xc3f   :  { %v957_v16 = vadd.f32 %v954_v41, %v929_v11 }
 0xc41   :  { %v958_v19 = vmax.f32 %v957_v16, 0.0 }
 0xc43   :  { %2233 = vmatmul.msk.f32.vlgmr.msrb.gmra.mxu3 %vm269_vm4, %v958_v19 }
 0xc44   :  { %1292 = vmatpush.msrb.mxu3 %v2739_v4  ;;  %v2286_v4 = vld [vmem:[%s3409_s10] ss:$0 sm:$0xff] }
 0xc46   :  { %1293 = vmatpush.msrb.mxu3 %v2751_v6 }
 0xc48   :  { %1294 = vmatpush.msrb.mxu3 %v2764_v10 }
 0xc4a   :  { %1295 = vmatpush.msrb.mxu3 %v2775_v14  ;;  %v2287_v14 = vld [vmem:[%s3415_s16] ss:$0 sm:$0xff] }
 0xc4b   :  { %2236 = vmatmul.msk.f32.vlgmr.msra.gmra.mxu3 %vm269_vm4, %v958_v19 }
 0xcc6   :  { %v1013_v21 = vpop.f32.mrf.mxu3 }
 0xcc7   :  { %v1016_v22 = vadd.f32 %v1013_v21, %v989_v49  ;;  %v3008_v49 = vld [vmem:[%s3406_s7 + $0x30] sm:$0xff] }
 0xcc8   :  { %v3013_v21 = vld [vmem:[%s3411_s12 + $0x30] sm:$0xff]  ;;  %1265 = vmatpush.msrb.mxu2 %v3008_v49 }
 0xcc9   :  { %v1041_v25 = vadd.f32 %v1038_v23, %v1016_v22  ;;  %1351 = vmatpush.msrb.mxu1 %v3013_v21  ;;  %v3020_v22 = vld [vmem:[%s3406_s7 + $0x28] sm:$0xff] }
 0xcca   :  { %v3025_v23 = vld [vmem:[%s3411_s12 + $0x28] sm:$0xff]  ;;  %1266 = vmatpush.msrb.mxu2 %v3020_v22 }
 0xccb   :  { %v1042_v26 = vmax.f32 %v1041_v25, 0.0  ;;  %1352 = vmatpush.msrb.mxu1 %v3025_v23  ;;  %v3032_v25 = vld [vmem:[%s3406_s7 + $0x20] sm:$0xff] }
 0xccc   :  { %1267 = vmatpush.msrb.mxu2 %v3032_v25 }
 0xccd   :  { %2235 = vmatmul.msk.f32.vlgmr.msra.gmra.mxu2 %vm269_vm4, %v1042_v26  ;;  %2237 = vmatmul.msk.f32.vlgmr.msra.gmra.mxu0 %vm269_vm4, %v1042_v26  ;;  %v3037_v26 = vld [vmem:[%s3411_s12 + $0x20] sm:$0xff] }
 0xcce   :  { %v1096_v6 = vpop.f32.mrf.mxu3  ;;  %1404 = vmatpush.msra.mxu0 %v2836_v0  ;;  %1353 = vmatpush.msrb.mxu1 %v3037_v26 }
 0xccf   :  { %v1097_v10 = vadd.f32 %v2286_v4, %v1096_v6  ;;  %v3044_v4 = vld [vmem:[%s3406_s7 + $0x18] sm:$0xff] }
 0xcd0   :  { %1405 = vmatpush.msra.mxu0 %v2841_v2  ;;  %v3049_v6 = vld [vmem:[%s3411_s12 + $0x18] sm:$0xff]  ;;  %1268 = vmatpush.msrb.mxu2 %v3044_v4 }
 0xcd1   :  { %2238 = vmatmul.msk.f32.vlgmr.msra.gmra.mxu1 %vm117_vm1, %v1097_v10  ;;  %2240 = vmatmul.msk.f32.vlgmr.msrb.gmra.mxu3 %vm117_vm1, %v1097_v10  ;;  %v3056_v10 = vld [vmem:[%s3406_s7 + $0x10] sm:$0xff] }
 0xcd2   :  { %1406 = vmatpush.msra.mxu0 %v2848_v35  ;;  %1354 = vmatpush.msrb.mxu1 %v3049_v6 }
 0xcd3   :  { %1269 = vmatpush.msrb.mxu2 %v3056_v10 }
 0xcd4   :  { %1407 = vmatpush.msra.mxu0 %v2854_v43 }
 0xd4a   :  { %v1122_v50 = vpop.f32.mrf.mxu0 }
 0xd4b   :  { %v1123_v27 = vadd.f32 %v2287_v14, %v1122_v50  ;;  %v3061_v14 = vld [vmem:[%s3411_s12 + $0x10] sm:$0xff]  ;;  %v3068_v50 = vld [vmem:[%s3406_s7 + $0x8] sm:$0xff] }
 0xd4c   :  { %1355 = vmatpush.msrb.mxu1 %v3061_v14  ;;  %1270 = vmatpush.msrb.mxu2 %v3068_v50 }
 0xd4d   :  { %2241 = vmatmul.msk.f32.vlgmr.msrb.gmra.mxu0 %vm117_vm1, %v1123_v27 }
 0xd4e   :  { %v1149_v52 = vpop.f32.mrf.mxu1 }
 0xd4f   :  { %v1153_v32 = vrot.slane %v1149_v52, 1  ;;  %v1154_v31 = vperm.slane %v1149_v52, 0  ;;  %v3085_v52 = vld [vmem:[%s3411_s12] sm:$0xff] }
 0xd50   :  { %v1069_v54 = vpop.f32.mrf.mxu2 }
 0xd51   :  { %v1155_v33 = vperm.slane %v1153_v32, 0  ;;  %v1158_v56 = vadd.f32 %v1154_v31, %v2511_v12  ;;  %v1070_v37 = vadd.f32 %v2288_v28, %v1069_v54  ;;  %v3080_v28 = vld [vmem:[%s3406_s7] sm:$0xff] }
 0xd52   :  { %1271 = vmatpush.msrb.mxu2 %v3080_v28  ;;  %v3092_v31 = vld [vmem:[%s3427_s22] sm:$0xff] }
 0xd53   :  { %v1159_v58 = vadd.f32 %v1155_v33, %v2521_v18  ;;  %v1160_v60 = vmax.f32 %v1158_v56, 0.0  ;;  %1072 = vst.msk [vmem:[#allocation2 + $0x2] sm:$0x3] %vm324_vm5, %v1070_v37 }
 0xd55   :  { %2244 = vmatmul.msk.f32.vlgmr.msra.gmra.mxu0 %vm117_vm1, %v1123_v27  ;;  %v1162_v17 = vmul.f32 %v2516_v13, %v1160_v60  ;;  %v1161_v62 = vmax.f32 %v1159_v58, 0.0  ;;  %v3073_v27 = vld [vmem:[%s3411_s12 + $0x8] sm:$0xff] }
 0xd56   :  { %1356 = vmatpush.msrb.mxu1 %v3073_v27  ;;  %v3099_v60 = vld [vmem:[%s3427_s22 + $0x8] sm:$0xff] }
 0xd57   :  { %v1164_v34 = vsel %vm117_vm1, %v1162_v17, 0.0  ;;  %v1163_v44 = vmul.f32 %v2516_v13, %v1161_v62 }
 0xd58   :  { %1165 = vadd.xlane.f32.xlu0 %v1164_v34  ;;  %1357 = vmatpush.msrb.mxu1 %v3085_v52 }
 0xd59   :  { %v1167_v45 = vsel %vm117_vm1, %v1163_v44, 0.0 }
 0xd5a   :  { %1168 = vadd.xlane.f32.xlu2 %v1167_v45 }
 0xdcb   :  { %v1166_v46 = vpop.xlane.xlu0 %1165 }
 0xdcc   :  { %v1172_v48 = vperm.slane %v1166_v46, %v2526_v24 }
 0xdcd   :  { %v1169_v47 = vpop.xlane.xlu2 %1168 }
 0xdce   :  { %v1173_v15 = vperm.slane %v1169_v47, %v2526_v24 }
 0xdd0   :  { %v1174_v29 = vsel %vm130_vm2, %v1173_v15, %v1172_v48 }
 0xdd1   :  { %v1176_v30 = vsel %vm133_vm3, %v1174_v29, -inf }
 0xdd2   :  { %1177 = vmax.xlane.f32.xlu1 %v1176_v30 }
 0xe45   :  { %v1178_v53 = vpop.xlane.xlu1 %1177 }
 0xe46   :  { %v1180_v57 = vperm.slane %v1178_v53, 0  ;;  %v1181_v59 = vperm.slane %v1178_v53, 1 }
 0xe48   :  { %v1184_v61 = vsub.f32 %v1166_v46, %v1180_v57  ;;  %v1185_v13 = vsub.f32 %v1169_v47, %v1181_v59  ;;  %v3109_v59 = vld [vmem:[%s3412_s13 + $0x8] sm:$0xff] }
 0xe49   :  { %1381 = vmatpush.msra.mxu3 %v3109_v59 }
 0xe4a   :  { %v1186_v63 = vmul.f32 1.442695, %v1184_v61  ;;  %v1188_v1 = vmul.f32 1.442695, %v1185_v13  ;;  %v3115_v61 = vld [vmem:[%s3412_s13] sm:$0xff]  ;;  %v3121_v13 = vld [vmem:[%s3408_s9 + $0x8] sm:$0xff] }
 0xe4b   :  { %1382 = vmatpush.msra.mxu3 %v3115_v61 }
 0xe4c   :  { %2320 = vpow2.f32 %v1186_v63  ;;  %v3126_v63 = vld [vmem:[%s3408_s9] sm:$0xff] }
 0xe4d   :  { %2322 = vpow2.f32 %v1188_v1  ;;  %1468 = vmatpush.msrb.mxu3 %v3121_v13  ;;  %v2290_v1 = vld [vmem:[%s3407_s8] ss:$0 sm:$0xff] }
 0xe4f   :  { %1469 = vmatpush.msrb.mxu3 %v3126_v63 }
 0xe52   :  { %v2321_v3 = vpop.eup %2320 }
 0xe53   :  { %v2323_v39 = vpop.eup %2322  ;;  %1193 = vperm.xlu1 %2269, %v2321_v3  }
 0xe54   :  { %1196 = vperm.xlu0 %2271, %v2323_v39  }
 0xec5   :  { %v1194_v40 = vpop.permute.xlu1 %1193 }
 0xec6   :  { %v1197_v51 = vpop.permute.xlu0 %1196  ;;  %v1198_v5 = vperm.slane %v1194_v40, %v2526_v24  ;;  %v1297_v40 = vpop.f32.mrf.mxu3 }
 0xec7   :  { %v1199_v9 = vperm.slane %v1197_v51, %v2526_v24 }
 0xec9   :  { %v1200_v8 = vsel %vm130_vm2, %v1199_v9, %v1198_v5  ;;  %v1325_v5 = vpop.f32.mrf.mxu0 }
 0xeca   :  { %v1202_v36 = vsel %vm133_vm3, %v1200_v8, 0.0 }
 0xecb   :  { %1203 = vadd.xlane.f32.xlu1 %v1202_v36  ;;  %v3138_v36 = vld [vmem:[%s3429_s1 + $0x18] sm:$0xff] }
 0xecc   :  { %1519 = vmatpush.msra.mxu1 %v3138_v36 }
 0xf3e   :  { %v1204_v38 = vpop.xlane.xlu1 %1203 }
 0xf3f   :  { %2324 = vrcp.f32 %v1204_v38  ;;  %v3143_v38 = vld [vmem:[%s3416_s17 + $0x8] sm:$0xff] }
 0xf40   :  { %1437 = vmatpush.msra.mxu2 %v3143_v38 }
 0xf45   :  { %v2325_v7 = vpop.eup %2324 }
 0xf46   :  { %v1208_v11 = vperm.slane %v2325_v7, 1  ;;  %v1207_v41 = vperm.slane %v2325_v7, 0  ;;  %v3148_v7 = vld [vmem:[%s3414_s15 + $0x8] sm:$0xff] }
 0xf47   :  { %1494 = vmatpush.msrb.mxu0 %v3148_v7 }
 0xf48   :  { %v1212_v16 = vmul.f32 %v2323_v39, %v1208_v11  ;;  %v1211_v19 = vmul.f32 %v2321_v3, %v1207_v41  ;;  %v3155_v11 = vld [vmem:[%s3404_s5 + $0x18] sm:$0xff]  ;;  %v1502_v41 = vld [vmem:[%s3429_s1 + $0x10] sm:$0xff] }
 0xf49   :  { %1520 = vmatpush.msra.mxu1 %v1502_v41 }
 0xf4a   :  { %1220 = vperm.xlu0 %2271, %v1212_v16   ;;  %1215 = vperm.xlu2 %2270, %v1211_v19   ;;  %v3165_v16 = vld [vmem:[%s3416_s17] sm:$0xff]  ;;  %s2369_s17 = smov [#allocation2]  }
 0xf4b   :  { %v3170_v19 = vld [vmem:[%s3414_s15] sm:$0xff]  ;;  %1438 = vmatpush.msra.mxu2 %v3165_v16  ;;  %s2199_s0 = sshll.u32 %s2369_s17, 4  ;;  %s2201_s15 = sshll.u32 %s3418_s19, 4  ;;  %s2200_s0 = int_to_ptr.vmem [resolvable:$true] %s2199_s0  ;;  %s2202_s15 = int_to_ptr.hbm [resolvable:$true] %s2201_s15 }
 0xf4c   :  { %1495 = vmatpush.msrb.mxu0 %v3170_v19 }
 0xfa4   :  { %v1216_v32 = vpop.permute.xlu2 %1215 }
 0xfa5   :  { %v1223_v54 = vmul.f32 %v3092_v31, %v1216_v32  ;;  %v3176_v32 = vld [vmem:[%s3404_s5 + $0x10] sm:$0xff] }
 0xfa7   :  { %v1225_v33 = vsel %vm73_vm0, %v1223_v54, 0.0  ;;  %v1501_v54 = vld [vmem:[%s3429_s1 + $0x8] sm:$0xff] }
 0xfa8   :  { %v1226_v56 = vrot.slane %v1225_v33, 4  ;;  %1521 = vmatpush.msra.mxu1 %v1501_v54 }
 0xfaa   :  { %v1227_v37 = vadd.f32 %v1226_v56, %v1225_v33  ;;  %v3186_v33 = vld [vmem:[%s3404_s5 + $0x8] sm:$0xff]  ;;  %v1500_v56 = vld [vmem:[%s3429_s1] sm:$0xff] }
 0xfab   :  { %1522 = vmatpush.msra.mxu1 %v1500_v56 }
 0xfac   :  { %v1228_v62 = vrot.slane %v1227_v37, 2 }
 0xfae   :  { %v1229_v45 = vadd.f32 %v1228_v62, %v1227_v37  ;;  %v3196_v37 = vld [vmem:[%s3404_s5] sm:$0xff] }
 0xfaf   :  { %v2289_v62 = vld [vmem:[%s3413_s14] ss:$0 sm:$0xff] }
 0xfb0   :  { %v1230_v48 = vrot.slane %v1229_v45, 1 }
 0xfb2   :  { %v1231_v30 = vadd.f32 %v1230_v48, %v1229_v45 }
 0xfbc   :  { %v1221_v58 = vpop.permute.xlu0 %1220 }
 0xfbd   :  { %v1224_v17 = vmul.f32 %v3099_v60, %v1221_v58  ;;  %v3203_v58 = vld [vmem:[%s3405_s6 + $0x18] sm:$0xff] }
 0xfbe   :  { %1695 = vmatpush.msra.mxu0 %v3203_v58 }
 0xfbf   :  { %v1232_v34 = vsel %vm73_vm0, %v1224_v17, 0.0  ;;  %v3208_v17 = vld [vmem:[%s3405_s6 + $0x10] sm:$0xff] }
 0xfc0   :  { %v1233_v44 = vrot.slane %v1232_v34, 4  ;;  %1696 = vmatpush.msra.mxu0 %v3208_v17 }
 0xfc2   :  { %v1234_v46 = vadd.f32 %v1233_v44, %v1232_v34 }
 0xfc4   :  { %v1235_v47 = vrot.slane %v1234_v46, 2 }
 0xfc6   :  { %v1236_v15 = vadd.f32 %v1235_v47, %v1234_v46  ;;  %v1409_v47 = vpop.f32.mrf.mxu0 }
 0xfc8   :  { %v1237_v29 = vrot.slane %v1236_v15, 1 }
 0xfca   :  { %v1238_v53 = vadd.f32 %v1237_v29, %v1236_v15  ;;  %v2291_v29 = vld [vmem:[%s3409_s10] ss:$0 sm:$0xff] }
 0xfcc   :  { %v1253_v57 = vsel %vm130_vm2, %v1238_v53, %v1231_v30 }
 0xfcd   :  { %2239 = vmatmul.msk.f32.vlgmr.msrb.gmra.mxu2 %vm73_vm0, %v1253_v57  ;;  %2242 = vmatmul.msk.f32.vlgmr.msrb.gmra.mxu1 %vm73_vm0, %v1253_v57  ;;  %v1677_v57 = vld [vmem:[%s3405_s6 + $0x8] sm:$0xff] }
 0xfce   :  { %1639 = vmatpush.msrb.mxu2 %v2996_v42  ;;  %1725 = vmatpush.msrb.mxu1 %v3001_v20 }
 0xfcf   :  { %1697 = vmatpush.msra.mxu0 %v1677_v57 }
 0xfd0   :  { %1640 = vmatpush.msrb.mxu2 %v3008_v49  ;;  %1726 = vmatpush.msrb.mxu1 %v3013_v21 }
 0xfd2   :  { %1641 = vmatpush.msrb.mxu2 %v3020_v22  ;;  %1727 = vmatpush.msrb.mxu1 %v3025_v23 }
 0xfd4   :  { %1642 = vmatpush.msrb.mxu2 %v3032_v25  ;;  %1728 = vmatpush.msrb.mxu1 %v3037_v26 }
 0xfd6   :  { %1643 = vmatpush.msrb.mxu2 %v3044_v4  ;;  %1729 = vmatpush.msrb.mxu1 %v3049_v6 }
 0xfd8   :  { %1644 = vmatpush.msrb.mxu2 %v3056_v10  ;;  %1730 = vmatpush.msrb.mxu1 %v3061_v14 }
 0xfda   :  { %1645 = vmatpush.msrb.mxu2 %v3068_v50  ;;  %1731 = vmatpush.msrb.mxu1 %v3073_v27 }
 0xfdc   :  { %1646 = vmatpush.msrb.mxu2 %v3080_v28  ;;  %1732 = vmatpush.msrb.mxu1 %v3085_v52 }
0x104a   :  { %v1359_v34 = vpop.f32.mrf.mxu1 }
0x104b   :  { %v1360_v44 = vadd.f32 %v2289_v62, %v1359_v34 }
0x1050   :  { %v1273_v3 = vpop.f32.mrf.mxu2 }
0x1051   :  { %v1274_v39 = vadd.f32 %v2290_v1, %v1273_v3  ;;  %v1676_v1 = vld [vmem:[%s3405_s6] sm:$0xff] }
0x1052   :  { %1698 = vmatpush.msra.mxu0 %v1676_v1 }
0x1053   :  { %v1300_v51 = vadd.f32 %v1297_v40, %v1274_v39 }
0x1055   :  { %v1328_v9 = vadd.f32 %v1325_v5, %v1300_v51  ;;  %v3265_v5 = vld [vmem:[%s3403_s4] ss:$0 sm:$0xff] }
0x1057   :  { %v1329_v8 = vmax.f32 %v1328_v9, 0.0 }
0x1059   :  { %2243 = vmatmul.msk.f32.vlgmr.msra.gmra.mxu3 %vm269_vm4, %v1329_v8 }
0x105a   :  { %1667 = vmatpush.msra.mxu3 %v3155_v11 }
0x105c   :  { %1668 = vmatpush.msra.mxu3 %v3176_v32 }
0x105e   :  { %1669 = vmatpush.msra.mxu3 %v3186_v33 }
0x1060   :  { %1670 = vmatpush.msra.mxu3 %v3196_v37 }
0x1061   :  { %2246 = vmatmul.msk.f32.vlgmr.msrb.gmra.mxu3 %vm269_vm4, %v1329_v8 }
0x1062   :  { %1756 = vmatpush.msrb.mxu3 %v3109_v59 }
0x1064   :  { %1757 = vmatpush.msrb.mxu3 %v3115_v61 }
0x10dc   :  { %v1384_v45 = vpop.f32.mrf.mxu3 }
0x10dd   :  { %v1387_v46 = vadd.f32 %v1384_v45, %v1360_v44 }
0x10df   :  { %v1412_v48 = vadd.f32 %v1409_v47, %v1387_v46 }
0x10e1   :  { %v1413_v15 = vmax.f32 %v1412_v48, 0.0 }
0x10e3   :  { %2245 = vmatmul.msk.f32.vlgmr.msra.gmra.mxu2 %vm269_vm4, %v1413_v15  ;;  %2247 = vmatmul.msk.f32.vlgmr.msrb.gmra.mxu0 %vm269_vm4, %v1413_v15 }
0x10e4   :  { %v1471_v30 = vpop.f32.mrf.mxu3  ;;  %1812 = vmatpush.msra.mxu2 %v3143_v38  ;;  %1779 = vmatpush.msrb.mxu0 %v2836_v0 }
0x10e5   :  { %v1472_v53 = vadd.f32 %v2291_v29, %v1471_v30 }
0x10e6   :  { %1813 = vmatpush.msra.mxu2 %v3165_v16  ;;  %1780 = vmatpush.msrb.mxu0 %v2841_v2 }
0x10e7   :  { %2248 = vmatmul.msk.f32.vlgmr.msra.gmra.mxu1 %vm117_vm1, %v1472_v53  ;;  %2250 = vmatmul.msk.f32.vlgmr.msra.gmra.mxu3 %vm117_vm1, %v1472_v53 }
0x10e8   :  { %1839 = vmatpush.msra.mxu3 %v3121_v13  ;;  %1890 = vmatpush.msra.mxu1 %v3138_v36  ;;  %v2292_v13 = vld [vmem:[%s3415_s16] ss:$0 sm:$0xff] }
0x10e9   :  { %1781 = vmatpush.msrb.mxu0 %v2848_v35 }
0x10ea   :  { %1840 = vmatpush.msra.mxu3 %v3126_v63  ;;  %1891 = vmatpush.msra.mxu1 %v1502_v41 }
0x10eb   :  { %1782 = vmatpush.msrb.mxu0 %v2854_v43 }
0x10ec   :  { %1892 = vmatpush.msra.mxu1 %v1501_v54 }
0x10ee   :  { %1893 = vmatpush.msra.mxu1 %v1500_v56 }
0x1160   :  { %v1497_v63 = vpop.f32.mrf.mxu0 }
0x1161   :  { %v1498_v3 = vadd.f32 %v2292_v13, %v1497_v63 }
0x1163   :  { %2251 = vmatmul.msk.f32.vlgmr.msra.gmra.mxu0 %vm117_vm1, %v1498_v3 }
0x1164   :  { %v1524_v39 = vpop.f32.mrf.mxu1  ;;  %1865 = vmatpush.msra.mxu0 %v3148_v7 }
0x1165   :  { %v1528_v40 = vrot.slane %v1524_v39, 1  ;;  %v1529_v51 = vperm.slane %v1524_v39, 0 }
0x1166   :  { %1866 = vmatpush.msra.mxu0 %v3170_v19 }
0x1167   :  { %v1530_v0 = vperm.slane %v1528_v40, 0  ;;  %v1533_v2 = vadd.f32 %v1529_v51, %v2511_v12 }
0x1169   :  { %v1534_v35 = vadd.f32 %v1530_v0, %v2521_v18  ;;  %v1535_v43 = vmax.f32 %v1533_v2, 0.0 }
0x116b   :  { %2254 = vmatmul.msk.f32.vlgmr.msrb.gmra.mxu0 %vm117_vm1, %v1498_v3  ;;  %v1537_v9 = vmul.f32 %v3265_v5, %v1535_v43  ;;  %v1536_v8 = vmax.f32 %v1534_v35, 0.0 }
0x116c   :  { %2066 = vmatpush.msrb.mxu0 %v3203_v58 }
0x116d   :  { %v1539_v36 = vsel %vm117_vm1, %v1537_v9, 0.0  ;;  %v1538_v7 = vmul.f32 %v3265_v5, %v1536_v8 }
0x116e   :  { %1540 = vadd.xlane.f32.xlu0 %v1539_v36  ;;  %2067 = vmatpush.msrb.mxu0 %v3208_v17 }
0x116f   :  { %v1542_v41 = vsel %vm117_vm1, %v1538_v7, 0.0 }
0x1170   :  { %1543 = vadd.xlane.f32.xlu2 %v1542_v41  ;;  %2068 = vmatpush.msrb.mxu0 %v1677_v57 }
0x1172   :  { %2069 = vmatpush.msrb.mxu0 %v1676_v1 }
0x11e1   :  { %v1541_v19 = vpop.xlane.xlu0 %1540 }
0x11e2   :  { %v1547_v56 = vperm.slane %v1541_v19, %v2526_v24 }
0x11e3   :  { %v1544_v54 = vpop.xlane.xlu2 %1543 }
0x11e4   :  { %v1548_v62 = vperm.slane %v1544_v54, %v2526_v24 }
0x11e6   :  { %v1549_v58 = vsel %vm130_vm2, %v1548_v62, %v1547_v56 }
0x11e7   :  { %v1551_v34 = vsel %vm133_vm3, %v1549_v58, -inf }
0x11e8   :  { %1552 = vmax.xlane.f32.xlu1 %v1551_v34 }
0x125b   :  { %v1553_v44 = vpop.xlane.xlu1 %1552 }
0x125c   :  { %v1555_v45 = vperm.slane %v1553_v44, 0  ;;  %v1556_v46 = vperm.slane %v1553_v44, 1 }
0x125e   :  { %v1559_v17 = vsub.f32 %v1541_v19, %v1555_v45  ;;  %v1560_v47 = vsub.f32 %v1544_v54, %v1556_v46 }
0x1260   :  { %v1561_v48 = vmul.f32 1.442695, %v1559_v17  ;;  %v1563_v15 = vmul.f32 1.442695, %v1560_v47 }
0x1262   :  { %2326 = vpow2.f32 %v1561_v48 }
0x1263   :  { %2328 = vpow2.f32 %v1563_v15 }
0x1268   :  { %v2327_v29 = vpop.eup %2326 }
0x1269   :  { %v2329_v30 = vpop.eup %2328  ;;  %1568 = vperm.xlu1 %2269, %v2327_v29  }
0x126a   :  { %1571 = vperm.xlu0 %2271, %v2329_v30  }
0x12db   :  { %v1569_v53 = vpop.permute.xlu1 %1568 }
0x12dc   :  { %v1572_v57 = vpop.permute.xlu0 %1571  ;;  %v1573_v1 = vperm.slane %v1569_v53, %v2526_v24 }
0x12dd   :  { %v1574_v13 = vperm.slane %v1572_v57, %v2526_v24  ;;  %v2298_v57 = vld [vmem:[%s3417_s18] ss:$0 sm:$0xff] }
0x12df   :  { %v1575_v63 = vsel %vm130_vm2, %v1574_v13, %v1573_v1 }
0x12e0   :  { %v1577_v3 = vsel %vm133_vm3, %v1575_v63, 0.0 }
0x12e1   :  { %1578 = vadd.xlane.f32.xlu2 %v1577_v3 }
0x1354   :  { %v1579_v39 = vpop.xlane.xlu2 %1578 }
0x1355   :  { %2330 = vrcp.f32 %v1579_v39 }
0x135b   :  { %v2331_v40 = vpop.eup %2330 }
0x135c   :  { %v1583_v51 = vperm.slane %v2331_v40, 1  ;;  %v1582_v0 = vperm.slane %v2331_v40, 0 }
0x135e   :  { %v1587_v2 = vmul.f32 %v2329_v30, %v1583_v51  ;;  %v1586_v35 = vmul.f32 %v2327_v29, %v1582_v0  ;;  %v2297_v29 = vld [vmem:[%s3415_s16] ss:$0 sm:$0xff] }
0x1360   :  { %1595 = vperm.xlu1 %2269, %v1587_v2   ;;  %1590 = vperm.xlu0 %2271, %v1586_v35  }
0x13d2   :  { %v1596_v43 = vpop.permute.xlu1 %1595  ;;  %v1591_v9 = vpop.permute.xlu0 %1590 }
0x13d3   :  { %v1599_v8 = vmul.f32 %v3099_v60, %v1596_v43  ;;  %v1598_v36 = vmul.f32 %v3092_v31, %v1591_v9 }
0x13d5   :  { %v1607_v7 = vsel %vm73_vm0, %v1599_v8, 0.0  ;;  %v1600_v41 = vsel %vm73_vm0, %v1598_v36, 0.0 }
0x13d6   :  { %v1608_v19 = vrot.slane %v1607_v7, 4  ;;  %v1601_v54 = vrot.slane %v1600_v41, 4 }
0x13d8   :  { %v1609_v56 = vadd.f32 %v1608_v19, %v1607_v7  ;;  %v1602_v62 = vadd.f32 %v1601_v54, %v1600_v41 }
0x13da   :  { %v1610_v58 = vrot.slane %v1609_v56, 2  ;;  %v1603_v34 = vrot.slane %v1602_v62, 2 }
0x13dc   :  { %v1611_v44 = vadd.f32 %v1610_v58, %v1609_v56  ;;  %v1604_v45 = vadd.f32 %v1603_v34, %v1602_v62 }
0x13de   :  { %v1612_v46 = vrot.slane %v1611_v44, 1  ;;  %v1605_v17 = vrot.slane %v1604_v45, 1 }
0x13e0   :  { %v1613_v47 = vadd.f32 %v1612_v46, %v1611_v44  ;;  %v1606_v48 = vadd.f32 %v1605_v17, %v1604_v45 }
0x13e2   :  { %v1628_v15 = vsel %vm130_vm2, %v1613_v47, %v1606_v48 }
0x13e3   :  { %2249 = vmatmul.msk.f32.vlgmr.msrb.gmra.mxu2 %vm73_vm0, %v1628_v15  ;;  %2252 = vmatmul.msk.f32.vlgmr.msrb.gmra.mxu1 %vm73_vm0, %v1628_v15 }
0x13e4   :  { %2010 = vmatpush.msrb.mxu2 %v2996_v42  ;;  %2096 = vmatpush.msrb.mxu1 %v3001_v20  ;;  %v3304_v42 = vpop.f32.mrf.mxu2  ;;  %v2295_v20 = vld [vmem:[%s3407_s8] ss:$0 sm:$0xff] }
0x13e6   :  { %2011 = vmatpush.msrb.mxu2 %v3008_v49  ;;  %2097 = vmatpush.msrb.mxu1 %v3013_v21 }
0x13e8   :  { %2012 = vmatpush.msrb.mxu2 %v3020_v22  ;;  %2098 = vmatpush.msrb.mxu1 %v3025_v23  ;;  %v1672_v22 = vpop.f32.mrf.mxu3 }
0x13ea   :  { %2013 = vmatpush.msrb.mxu2 %v3032_v25  ;;  %2099 = vmatpush.msrb.mxu1 %v3037_v26  ;;  %v1700_v25 = vpop.f32.mrf.mxu0 }
0x13ec   :  { %2014 = vmatpush.msrb.mxu2 %v3044_v4  ;;  %2100 = vmatpush.msrb.mxu1 %v3049_v6  ;;  %v2294_v6 = vld [vmem:[%s3413_s14] ss:$0 sm:$0xff] }
0x13ee   :  { %2015 = vmatpush.msrb.mxu2 %v3056_v10  ;;  %2101 = vmatpush.msrb.mxu1 %v3061_v14 }
0x13f0   :  { %2016 = vmatpush.msrb.mxu2 %v3068_v50  ;;  %2102 = vmatpush.msrb.mxu1 %v3073_v27 }
0x13f2   :  { %2017 = vmatpush.msrb.mxu2 %v3080_v28  ;;  %2103 = vmatpush.msrb.mxu1 %v3085_v52  ;;  %v1784_v28 = vpop.f32.mrf.mxu0 }
0x1460   :  { %v1734_v10 = vpop.f32.mrf.mxu1 }
0x1461   :  { %v1735_v14 = vadd.f32 %v2294_v6, %v1734_v10  ;;  %v2282_v10 = vld [vmem:[%s3417_s18] ss:$0 sm:$0xff] }
0x1466   :  { %v1648_v49 = vpop.f32.mrf.mxu2 }
0x1467   :  { %v1649_v21 = vadd.f32 %v2295_v20, %v1648_v49 }
0x1469   :  { %v1675_v23 = vadd.f32 %v1672_v22, %v1649_v21 }
0x146b   :  { %v1703_v26 = vadd.f32 %v1700_v25, %v1675_v23 }
0x146d   :  { %v1704_v4 = vmax.f32 %v1703_v26, 0.0 }
0x146f   :  { %2253 = vmatmul.msk.f32.vlgmr.msrb.gmra.mxu3 %vm269_vm4, %v1704_v4 }
0x1470   :  { %2038 = vmatpush.msrb.mxu3 %v3155_v11 }
0x1472   :  { %2039 = vmatpush.msrb.mxu3 %v3176_v32  ;;  %v2296_v32 = vld [vmem:[%s3409_s10] ss:$0 sm:$0xff] }
0x1474   :  { %2040 = vmatpush.msrb.mxu3 %v3186_v33  ;;  %v2137_v33 = vld [vmem:[%s3410_s11 + $0x18] sm:$0xff] }
0x1476   :  { %2041 = vmatpush.msrb.mxu3 %v3196_v37  ;;  %v2136_v37 = vld [vmem:[%s3410_s11 + $0x10] sm:$0xff] }
0x1477   :  { %2256 = vmatmul.msk.f32.vlgmr.msra.gmra.mxu3 %vm269_vm4, %v1704_v4 }
0x1478   :  { %2127 = vmatpush.msra.mxu3 %v3109_v59 }
0x147a   :  { %2128 = vmatpush.msra.mxu3 %v3115_v61 }
0x14f2   :  { %v1759_v50 = vpop.f32.mrf.mxu3 }
0x14f3   :  { %v1762_v27 = vadd.f32 %v1759_v50, %v1735_v14  ;;  %v694_v14 = vadd.f32 %v2282_v10, %v2916_v55 }
0x14f5   :  { %v1787_v52 = vadd.f32 %v1784_v28, %v1762_v27 }
0x14f7   :  { %v1788_v11 = vmax.f32 %v1787_v52, 0.0 }
0x14f9   :  { %2255 = vmatmul.msk.f32.vlgmr.msra.gmra.mxu2 %vm269_vm4, %v1788_v11  ;;  %2257 = vmatmul.msk.f32.vlgmr.msra.gmra.mxu0 %vm269_vm4, %v1788_v11 }
0x14fa   :  { %v1842_v59 = vpop.f32.mrf.mxu3  ;;  %2183 = vmatpush.msra.mxu2 %v3143_v38  ;;  %2150 = vmatpush.msra.mxu0 %v2137_v33  ;;  %v2135_v38 = vld [vmem:[%s3410_s11 + $0x8] sm:$0xff] }
0x14fb   :  { %v1843_v61 = vadd.f32 %v2296_v32, %v1842_v59 }
0x14fc   :  { %2184 = vmatpush.msra.mxu2 %v3165_v16  ;;  %2151 = vmatpush.msra.mxu0 %v2136_v37  ;;  %v2134_v16 = vld [vmem:[%s3410_s11] sm:$0xff] }
0x14fd   :  { %2258 = vmatmul.msk.f32.vlgmr.msra.gmra.mxu1 %vm117_vm1, %v1843_v61  ;;  %2260 = vmatmul.msk.f32.vlgmr.msrb.gmra.mxu3 %vm117_vm1, %v1843_v61 }
0x14fe   :  { %2152 = vmatpush.msra.mxu0 %v2135_v38 }
0x1500   :  { %2153 = vmatpush.msra.mxu0 %v2134_v16 }
0x1576   :  { %v1868_v30 = vpop.f32.mrf.mxu0 }
0x1577   :  { %v1869_v53 = vadd.f32 %v2297_v29, %v1868_v30 }
0x1579   :  { %2261 = vmatmul.msk.f32.vlgmr.msrb.gmra.mxu0 %vm117_vm1, %v1869_v53 }
0x157a   :  { %v1895_v1 = vpop.f32.mrf.mxu1 }
0x157b   :  { %v1899_v13 = vrot.slane %v1895_v1, 1  ;;  %v1900_v63 = vperm.slane %v1895_v1, 0 }
0x157c   :  { %v1815_v3 = vpop.f32.mrf.mxu2 }
0x157d   :  { %v1901_v39 = vperm.slane %v1899_v13, 0  ;;  %v1904_v40 = vadd.f32 %v1900_v63, %v2511_v12  ;;  %v1816_v51 = vadd.f32 %v2298_v57, %v1815_v3  ;;  %v2300_v63 = vld [vmem:[%s3407_s8] ss:$0 sm:$0xff] }
0x157f   :  { %v1905_v0 = vadd.f32 %v1901_v39, %v2521_v18  ;;  %v1906_v2 = vmax.f32 %v1904_v40, 0.0  ;;  %1818 = vst.msk [vmem:[#allocation2 + $0x4] sm:$0x3] %vm324_vm5, %v1816_v51 }
0x1580   :  { %v2043_v40 = vpop.f32.mrf.mxu3 }
0x1581   :  { %2264 = vmatmul.msk.f32.vlgmr.msra.gmra.mxu0 %vm117_vm1, %v1869_v53  ;;  %v1908_v35 = vmul.f32 %v3265_v5, %v1906_v2  ;;  %v1907_v43 = vmax.f32 %v1905_v0, 0.0 }
0x1583   :  { %v1910_v9 = vsel %vm117_vm1, %v1908_v35, 0.0  ;;  %v1909_v8 = vmul.f32 %v3265_v5, %v1907_v43  ;;  %v2299_v43 = vld [vmem:[%s3413_s14] ss:$0 sm:$0xff] }
0x1584   :  { %1911 = vadd.xlane.f32.xlu2 %v1910_v9 }
0x1585   :  { %v1913_v36 = vsel %vm117_vm1, %v1909_v8, 0.0 }
0x1586   :  { %1914 = vadd.xlane.f32.xlu0 %v1913_v36 }
0x15f6   :  { %v2071_v0 = vpop.f32.mrf.mxu0 }
0x15f7   :  { %v1912_v12 = vpop.xlane.xlu2 %1911 }
0x15f8   :  { %v1918_v18 = vperm.slane %v1912_v12, %v2526_v24 }
0x15f9   :  { %v1915_v7 = vpop.xlane.xlu0 %1914 }
0x15fa   :  { %v1919_v41 = vperm.slane %v1915_v7, %v2526_v24 }
0x15fc   :  { %v1920_v19 = vsel %vm130_vm2, %v1919_v41, %v1918_v18 }
0x15fd   :  { %v1922_v54 = vsel %vm133_vm3, %v1920_v19, -inf  ;;  %v2301_v19 = vld [vmem:[%s3417_s18] ss:$0 sm:$0xff] }
0x15fe   :  { %1923 = vmax.xlane.f32.xlu1 %v1922_v54 }
0x1671   :  { %v1924_v56 = vpop.xlane.xlu1 %1923 }
0x1672   :  { %v1926_v62 = vperm.slane %v1924_v56, 0  ;;  %v1927_v58 = vperm.slane %v1924_v56, 1 }
0x1674   :  { %v1930_v34 = vsub.f32 %v1912_v12, %v1926_v62  ;;  %v1931_v44 = vsub.f32 %v1915_v7, %v1927_v58  ;;  %v2155_v7 = vpop.f32.mrf.mxu0 }
0x1676   :  { %v1932_v5 = vmul.f32 1.442695, %v1930_v34  ;;  %v1934_v45 = vmul.f32 1.442695, %v1931_v44 }
0x1678   :  { %2332 = vpow2.f32 %v1932_v5 }
0x1679   :  { %2334 = vpow2.f32 %v1934_v45 }
0x167e   :  { %v2333_v46 = vpop.eup %2332 }
0x167f   :  { %1939 = vperm.xlu2 %2270, %v2333_v46   ;;  %v2335_v17 = vpop.eup %2334 }
0x1687   :  { %1942 = vperm.xlu2 %2270, %v2335_v17  }
0x16d9   :  { %v1940_v47 = vpop.permute.xlu2 %1939 }
0x16da   :  { %v1944_v15 = vperm.slane %v1940_v47, %v2526_v24 }
0x16e1   :  { %v1943_v48 = vpop.permute.xlu2 %1942 }
0x16e2   :  { %v1945_v20 = vperm.slane %v1943_v48, %v2526_v24  ;;  %v2293_v24 = vld [vmem:[%s3417_s18] ss:$0 sm:$0xff] }
0x16e3   :  { %v1441_v50 = vadd.f32 %v2293_v24, %v3304_v42 }
0x16e4   :  { %v1946_v49 = vsel %vm130_vm2, %v1945_v20, %v1944_v15 }
0x16e5   :  { %v1948_v21 = vsel %vm133_vm3, %v1946_v49, 0.0 }
0x16e6   :  { %1949 = vadd.xlane.f32.xlu2 %v1948_v21 }
0x1759   :  { %v1950_v22 = vpop.xlane.xlu2 %1949 }
0x175a   :  { %2336 = vrcp.f32 %v1950_v22 }
0x1760   :  { %v2337_v23 = vpop.eup %2336 }
0x1761   :  { %v1954_v25 = vperm.slane %v2337_v23, 1  ;;  %v1953_v26 = vperm.slane %v2337_v23, 0 }
0x1763   :  { %v1958_v4 = vmul.f32 %v2335_v17, %v1954_v25  ;;  %v1957_v6 = vmul.f32 %v2333_v46, %v1953_v26 }
0x1765   :  { %1966 = vperm.xlu1 %2269, %v1958_v4   ;;  %1961 = vperm.xlu0 %2271, %v1957_v6  }
0x176d   :  { %1444 = vrot.lane.b32.xlu1 %v1441_v50, %s2368_s26  ;;  %697 = vrot.lane.b32.xlu0 %v694_v14, %s2368_s26 }
0x17d7   :  { %v1967_v27 = vpop.permute.xlu1 %1966  ;;  %v1962_v28 = vpop.permute.xlu0 %1961 }
0x17d8   :  { %v1970_v52 = vmul.f32 %v3099_v60, %v1967_v27  ;;  %v1969_v11 = vmul.f32 %v3092_v31, %v1962_v28 }
0x17da   :  { %v1978_v32 = vsel %vm73_vm0, %v1970_v52, 0.0  ;;  %v1971_v59 = vsel %vm73_vm0, %v1969_v11, 0.0 }
0x17db   :  { %v1979_v61 = vrot.slane %v1978_v32, 4  ;;  %v1972_v33 = vrot.slane %v1971_v59, 4 }
0x17dd   :  { %v1980_v55 = vadd.f32 %v1979_v61, %v1978_v32  ;;  %v1973_v37 = vadd.f32 %v1972_v33, %v1971_v59 }
0x17df   :  { %v1981_v42 = vrot.slane %v1980_v55, 2  ;;  %v1974_v38 = vrot.slane %v1973_v37, 2  ;;  %v1445_v16 = vpop.permute.xlu1 %1444  ;;  %v698_v29 = vpop.permute.xlu0 %697 }
0x17e0   :  { %1447 = vst.msk [vmem:[#allocation2 + $0x2] sm:$0x3] %vm700_vm6, %v1445_v16 }
0x17e1   :  { %v1982_v30 = vadd.f32 %v1981_v42, %v1980_v55  ;;  %v1975_v53 = vadd.f32 %v1974_v38, %v1973_v37  ;;  %701 = vst.msk [vmem:[#allocation2] sm:$0x3] %vm700_vm6, %v698_v29 }
0x17e3   :  { %v1983_v31 = vrot.slane %v1982_v30, 1  ;;  %v1976_v60 = vrot.slane %v1975_v53, 1 }
0x17e5   :  { %v1984_v57 = vadd.f32 %v1983_v31, %v1982_v30  ;;  %v1977_v1 = vadd.f32 %v1976_v60, %v1975_v53 }
0x17e7   :  { %v1999_v13 = vsel %vm130_vm2, %v1984_v57, %v1977_v1 }
0x17e8   :  { %2259 = vmatmul.msk.f32.vlgmr.msrb.gmra.mxu2 %vm73_vm0, %v1999_v13  ;;  %2262 = vmatmul.msk.f32.vlgmr.msrb.gmra.mxu1 %vm73_vm0, %v1999_v13 }
0x1865   :  { %v2105_v9 = vpop.f32.mrf.mxu1 }
0x1866   :  { %v2106_v8 = vadd.f32 %v2299_v43, %v2105_v9 }
0x186b   :  { %v2019_v3 = vpop.f32.mrf.mxu2 }
0x186c   :  { %v2020_v39 = vadd.f32 %v2300_v63, %v2019_v3 }
0x186e   :  { %v2046_v51 = vadd.f32 %v2043_v40, %v2020_v39 }
0x1870   :  { %v2074_v2 = vadd.f32 %v2071_v0, %v2046_v51 }
0x1872   :  { %v2075_v35 = vmax.f32 %v2074_v2, 0.0 }
0x1874   :  { %2263 = vmatmul.msk.f32.vlgmr.msra.gmra.mxu3 %vm269_vm4, %v2075_v35 }
0x18f7   :  { %v2130_v36 = vpop.f32.mrf.mxu3 }
0x18f8   :  { %v2133_v12 = vadd.f32 %v2130_v36, %v2106_v8 }
0x18fa   :  { %v2158_v18 = vadd.f32 %v2155_v7, %v2133_v12 }
0x18fc   :  { %v2159_v41 = vmax.f32 %v2158_v18, 0.0 }
0x18fe   :  { %2265 = vmatmul.msk.f32.vlgmr.msra.gmra.mxu2 %vm269_vm4, %v2159_v41 }
0x1981   :  { %v2186_v54 = vpop.f32.mrf.mxu2 }
0x1982   :  { %v2187_v56 = vadd.f32 %v2301_v19, %v2186_v54 }
0x1984   :  { %2190 = vrot.lane.b32.xlu0 %v2187_v56, %s2368_s26 }
0x19f6   :  { %v2191_v62 = vpop.permute.xlu0 %2190 }
0x19f7   :  { %2193 = vst.msk [vmem:[#allocation2 + $0x4] sm:$0x3] %vm700_vm6, %v2191_v62 }
0x19f8   :  { %2204 = dma.vmem_to_hbm [thread:$0]  %s2200_s0, 96, %s2202_s15, [#allocation3]  }
0x19f9   :  { %2365 = dma.done.wait [#allocation3], 96  }
0x19fa   :  { %2366 = vsyncadd [#allocation3], 4294967200 }
0x19fb   :  { %2209 = vsyncpa [#allocation3], 1 }

</bundles_post_ra>
